<compile_context>
chip_gen: v7x
topology: tpu7x:2x2x1
jax: 0.10.0
libtpu: 0.0.40
codegen_flags: <defaults>
</compile_context>

<pallas_src>
import functools
import jax
import jax.numpy as jnp
from jax import lax
from jax.experimental import pallas as pl
from jax.experimental.pallas import tpu as pltpu


# ----------------------------------------------------------------------------
# Config (small, deterministic)
# ----------------------------------------------------------------------------
class O:
    N = 2            # batch
    O = 3            # number of object slots
    T = 2            # number of time steps
    dim_h_o = 32     # tracker hidden size
    dim_C2_1 = 16    # number of memory locations (ha*wa)
    dim_C2_2 = 32    # memory feature size
    dim_y_e = 1
    dim_y_l = 3
    dim_y_p = 4
    D = 3
    h = 4
    w = 4
    dim_Y_s = h * w          # 16
    dim_Y_a = D * h * w      # 48
    fcn = [48]               # hidden layer(s) of the output FCN
    H = 16
    W = 16
    v = 0
    exp_config = 'no_rep'


PACK = 128   # lane-dense packed output width (Ho + dim_y = 104, padded to 128)


def _sigmoid(x):
    # 1 / (1 + exp(-x)) with the reciprocal on the (otherwise idle) EUP slot.
    return pl.reciprocal(1.0 + jnp.exp(-x), approx=True)


# ----------------------------------------------------------------------------
# Fused kernel: per (batch n, time t) grid step run all O NTM cells + the FCN
# ----------------------------------------------------------------------------
def tracker_kernel(Onum, Ho, C1, C2, DE, DL, DP, DS, DA,
                   h_prev_ref, C_seq_ref,
                   Wh_ref, bh_ref, Wih_ref, bih_ref,
                   Wev_ref, bev_ref, W1_ref, b1_ref, W2_ref, b2_ref,
                   out_ref, h_scr):
    f32 = jnp.float32
    eps = jnp.float32(1e-8)
    t = pl.program_id(1)

    # (Re)initialize the carried hidden state at the start of each batch
    # element's time loop (t is the trailing, sequential grid axis).
    @pl.when(t == 0)
    def _():
        h_scr[...] = h_prev_ref[0]

    h_all = h_scr[...]                      # (O, Ho)   previous-step hidden
    C = C_seq_ref[0, 0]                     # (C1, C2)  fresh memory for step t

    # key / beta / GRU-hidden projections for ALL slots in one MXU pass.
    # Fused columns: [0:C2) = k, [C2:C2+3Ho) = Whh h + bhh, [C2+3Ho] = beta_pre
    G = jnp.dot(h_all, Wh_ref[...], preferred_element_type=f32) + bh_ref[...]

    Wih = Wih_ref[...]
    bih = bih_ref[...]
    Wev = Wev_ref[...]
    bev = bev_ref[...]

    for i in range(Onum):   # static unroll: slots sequentially update C
        g_i = G[i:i + 1, :]                                  # (1, C2+3Ho+1)
        k = g_i[:, :C2]                                      # (1, C2)
        gh = g_i[:, C2:C2 + 3 * Ho]                          # (1, 3Ho)
        beta_pre = g_i[:, C2 + 3 * Ho:]                      # (1, 1)
        # softplus(x) + 1, single-exp stable form
        beta = (jnp.maximum(beta_pre, 0.0)
                + jnp.log1p(jnp.exp(-jnp.abs(beta_pre))) + 1.0)

        # cosine-similarity addressing; locations stay on the sublane axis.
        # Each norm is clamped separately (matches F.cosine_similarity).
        dotCk = lax.dot_general(C, k, (((1,), (1,)), ((), ())),
                                preferred_element_type=f32)          # (C1, 1)
        c_norm = jnp.sqrt(jnp.sum(C * C, axis=1, keepdims=True))     # (C1, 1)
        k_norm = jnp.sqrt(jnp.sum(k * k, axis=1, keepdims=True))     # (1, 1)
        inv_n = pl.reciprocal(jnp.maximum(c_norm, eps) * jnp.maximum(k_norm, eps),
                              approx=True)
        s = dotCk * inv_n                                            # (C1, 1)

        # attention weights: softmax over locations (sublane reduce)
        z = s * beta
        z = z - jnp.max(z, axis=0, keepdims=True)
        ez = jnp.exp(z)
        w = ez * pl.reciprocal(jnp.sum(ez, axis=0, keepdims=True), approx=True)

        # weighted read  r = w^T C  (cross-sublane reduce; avoids a degenerate
        # (C1,1) relayout — the MXU is already busy with the projections)
        r = jnp.sum(w * C, axis=0, keepdims=True)                    # (1, C2)

        # GRUCell(r, h_prev_i), gate order [r, z, n]
        gi = jnp.dot(r, Wih, preferred_element_type=f32) + bih       # (1, 3Ho)
        h_prev_i = h_all[i:i + 1, :]
        i_r, i_z, i_n = gi[:, :Ho], gi[:, Ho:2 * Ho], gi[:, 2 * Ho:]
        h_r, h_z, h_n = gh[:, :Ho], gh[:, Ho:2 * Ho], gh[:, 2 * Ho:]
        rg = _sigmoid(i_r + h_r)
        zg = _sigmoid(i_z + h_z)
        ng = jnp.tanh(i_n + rg * h_n)
        h_new = (1.0 - zg) * ng + zg * h_prev_i                      # (1, Ho)

        # erase / write memory update ('no_mem' not in exp_config)
        ev = jnp.dot(h_new, Wev, preferred_element_type=f32) + bev   # (1, 2*C2)
        e = _sigmoid(ev[:, :C2])
        v = ev[:, C2:]
        C = C * (1.0 - w * e) + w * v                                # (C1, C2)

        h_scr[i:i + 1, :] = h_new

    h_new_all = h_scr[...]                                           # (O, Ho)

    # output FCN (relu MLP) + head activations, all slots at once
    h1 = jnp.maximum(
        jnp.dot(h_new_all, W1_ref[...], preferred_element_type=f32) + b1_ref[...],
        0.0)
    a = jnp.dot(h1, W2_ref[...], preferred_element_type=f32) + b2_ref[...]

    c0 = DE
    c1 = DE + DL
    c2 = DE + DL + DP
    c3 = DE + DL + DP + DS
    c4 = DE + DL + DP + DS + DA
    a_e, a_l, a_p, a_s, a_a = a[:, :c0], a[:, c0:c1], a[:, c1:c2], a[:, c2:c3], a[:, c3:c4]

    y_e = jnp.abs(jnp.tanh(a_e))

    # TODO(synk): smd.STGumbelSoftmax adds Gumbel noise; deterministic
    # straight-through forward (hard one-hot of the argmax, first-index
    # tie-break) used here.
    m_l = jnp.max(a_l, axis=1, keepdims=True)
    iota_l = lax.broadcasted_iota(jnp.int32, a_l.shape, 1).astype(f32)
    first_max = jnp.min(jnp.where(a_l >= m_l, iota_l, jnp.float32(DL)),
                        axis=1, keepdims=True)
    y_l = (iota_l == first_max).astype(f32)

    y_p = jnp.tanh(a_p)

    # TODO(synk): smd.STGumbelSigmoid adds logistic noise; deterministic
    # straight-through forward (sigmoid(x) > 0.5  <=>  x > 0) used here.
    Y_s = (a_s > 0.0).astype(f32)
    Y_a = _sigmoid(a_a)

    # single lane-dense packed output slab:
    # [ h (Ho) | y_e | y_l | y_p | Y_s | Y_a | zero pad ]  -> width PACK
    out_ref[:, :, :, 0:Ho] = h_new_all[None, None]
    out_ref[:, :, :, Ho:Ho + c0] = y_e[None, None]
    out_ref[:, :, :, Ho + c0:Ho + c1] = y_l[None, None]
    out_ref[:, :, :, Ho + c1:Ho + c2] = y_p[None, None]
    out_ref[:, :, :, Ho + c2:Ho + c3] = Y_s[None, None]
    out_ref[:, :, :, Ho + c3:Ho + c4] = Y_a[None, None]
    if PACK > Ho + c4:
        out_ref[:, :, :, Ho + c4:PACK] = jnp.zeros(
            (1, 1, Onum, PACK - Ho - c4), dtype=f32)


# ----------------------------------------------------------------------------
# Parameters (deterministic init)
# ----------------------------------------------------------------------------
def make_params(o, key):
    Ho, C2 = o.dim_h_o, o.dim_C2_2
    dim_y = o.dim_y_e + o.dim_y_l + o.dim_y_p + o.dim_Y_s + o.dim_Y_a
    Hf = o.fcn[0]
    ks = jax.random.split(key, 16)

    def rnd(k, shape, scale=0.1):
        return scale * jax.random.normal(k, shape, dtype=jnp.float32)

    p = {
        # NTMCell linears (weights stored transposed: in_dim x out_dim)
        'Wk': rnd(ks[0], (Ho, C2)), 'bk': rnd(ks[1], (1, C2)),
        'Wb': rnd(ks[2], (Ho, 1)),  'bb': rnd(ks[3], (1, 1)),
        'We': rnd(ks[4], (Ho, C2)), 'be': rnd(ks[5], (1, C2)),
        'Wv': rnd(ks[6], (Ho, C2)), 'bv': rnd(ks[7], (1, C2)),
        # GRUCell (gate order r,z,n), transposed
        'Wih': rnd(ks[8], (C2, 3 * Ho)), 'Whh': rnd(ks[9], (Ho, 3 * Ho)),
        'bih': rnd(ks[10], (1, 3 * Ho)), 'bhh': rnd(ks[11], (1, 3 * Ho)),
        # FCN
        'W1': rnd(ks[12], (Ho, Hf)), 'b1': rnd(ks[13], (1, Hf)),
        'W2': rnd(ks[14], (Hf, dim_y)), 'b2': rnd(ks[15], (1, dim_y)),
    }
    return p


# ----------------------------------------------------------------------------
# TrackerArray forward (single fused pallas_call)
# ----------------------------------------------------------------------------
def tracker_array_forward(params, o, h_o_prev, y_e_prev, C_o_seq):
    # y_e_prev is carried by the reference module but is unused under
    # exp_config='no_rep' without 'act'; kept in the signature for fidelity.
    del y_e_prev
    N, Onum, Ho = h_o_prev.shape
    T = C_o_seq.shape[1]
    C1, C2 = o.dim_C2_1, o.dim_C2_2
    DE, DL, DP, DS, DA = o.dim_y_e, o.dim_y_l, o.dim_y_p, o.dim_Y_s, o.dim_Y_a
    dim_y = DE + DL + DP + DS + DA
    assert Ho + dim_y <= PACK

    # one-time weight fusion: linears sharing the same LHS become one matmul
    Wh = jnp.concatenate([params['Wk'], params['Whh'], params['Wb']], axis=1)
    bh = jnp.concatenate([params['bk'], params['bhh'], params['bb']], axis=1)
    Wev = jnp.concatenate([params['We'], params['Wv']], axis=1)
    bev = jnp.concatenate([params['be'], params['bv']], axis=1)

    kernel = functools.partial(tracker_kernel, Onum, Ho, C1, C2,
                               DE, DL, DP, DS, DA)

    def const_spec(shape):
        return pl.BlockSpec(shape, lambda n, t: (0,) * len(shape))

    slab = pl.pallas_call(
        kernel,
        out_shape=jax.ShapeDtypeStruct((N, T, Onum, PACK), jnp.float32),
        grid=(N, T),
        in_specs=[
            pl.BlockSpec((1, Onum, Ho), lambda n, t: (n, 0, 0)),      # h_o_prev
            pl.BlockSpec((1, 1, C1, C2), lambda n, t: (n, t, 0, 0)),  # C_o_seq
            const_spec(Wh.shape), const_spec(bh.shape),
            const_spec(params['Wih'].shape), const_spec(params['bih'].shape),
            const_spec(Wev.shape), const_spec(bev.shape),
            const_spec(params['W1'].shape), const_spec(params['b1'].shape),
            const_spec(params['W2'].shape), const_spec(params['b2'].shape),
        ],
        out_specs=pl.BlockSpec((1, 1, Onum, PACK), lambda n, t: (n, t, 0, 0)),
        scratch_shapes=[pltpu.VMEM((Onum, Ho), jnp.float32)],
        compiler_params=pltpu.CompilerParams(
            dimension_semantics=("parallel", "arbitrary")),
    )(h_o_prev, C_o_seq, Wh, bh, params['Wih'], params['bih'],
      Wev, bev, params['W1'], params['b1'], params['W2'], params['b2'])

    # split the packed slab once (cheap XLA slices on the full sequence)
    h_o_seq = slab[..., 0:Ho]
    y_e_seq = slab[..., Ho:Ho + DE]
    y_l_seq = slab[..., Ho + DE:Ho + DE + DL]
    y_p_seq = slab[..., Ho + DE + DL:Ho + DE + DL + DP]
    Y_s_seq = slab[..., Ho + DE + DL + DP:Ho + DE + DL + DP + DS]
    Y_a_seq = slab[..., Ho + DE + DL + DP + DS:Ho + DE + DL + DP + DS + DA]
    Y_s_seq = Y_s_seq.reshape(N, T, Onum, 1, o.h, o.w)
    Y_a_seq = Y_a_seq.reshape(N, T, Onum, o.D, o.h, o.w)
    return h_o_seq, y_e_seq, y_l_seq, y_p_seq, Y_s_seq, Y_a_seq


# ----------------------------------------------------------------------------
if __name__ == "__main__":
    o = O()
    key = jax.random.PRNGKey(0)
    kp, k1, k2, k3 = jax.random.split(key, 4)

    params = make_params(o, kp)
    h_o_prev = 0.1 * jax.random.normal(k1, (o.N, o.O, o.dim_h_o), dtype=jnp.float32)
    y_e_prev = jax.nn.sigmoid(jax.random.normal(k2, (o.N, o.O, o.dim_y_e), dtype=jnp.float32))
    C_o_seq = jax.random.normal(k3, (o.N, o.T, o.dim_C2_1, o.dim_C2_2), dtype=jnp.float32)

    fwd = jax.jit(functools.partial(tracker_array_forward, params, o))
    outs = fwd(h_o_prev, y_e_prev, C_o_seq)
    outs = jax.block_until_ready(outs)

    expected = {
        'h_o_seq': (o.N, o.T, o.O, o.dim_h_o),
        'y_e_seq': (o.N, o.T, o.O, o.dim_y_e),
        'y_l_seq': (o.N, o.T, o.O, o.dim_y_l),
        'y_p_seq': (o.N, o.T, o.O, o.dim_y_p),
        'Y_s_seq': (o.N, o.T, o.O, 1, o.h, o.w),
        'Y_a_seq': (o.N, o.T, o.O, o.D, o.h, o.w),
    }
    for arr, (name, shp) in zip(outs, expected.items()):
        assert arr.shape == shp, (name, arr.shape, shp)
        assert bool(jnp.all(jnp.isfinite(arr))), name

    print("KERNEL_OK")
</pallas_src>

<mosaic_0001>
module attributes {stable_mosaic.version = 11 : i64} {
  func.func @tracker_kernel(%arg0: i32, %arg1: i32, %arg2: memref<1x3x32xf32, #tpu.memory_space<vmem>>, %arg3: memref<1x1x16x32xf32, #tpu.memory_space<vmem>>, %arg4: memref<32x129xf32, #tpu.memory_space<vmem>>, %arg5: memref<1x129xf32, #tpu.memory_space<vmem>>, %arg6: memref<32x96xf32, #tpu.memory_space<vmem>>, %arg7: memref<1x96xf32, #tpu.memory_space<vmem>>, %arg8: memref<32x64xf32, #tpu.memory_space<vmem>>, %arg9: memref<1x64xf32, #tpu.memory_space<vmem>>, %arg10: memref<32x48xf32, #tpu.memory_space<vmem>>, %arg11: memref<1x48xf32, #tpu.memory_space<vmem>>, %arg12: memref<48x72xf32, #tpu.memory_space<vmem>>, %arg13: memref<1x72xf32, #tpu.memory_space<vmem>>, %arg14: memref<1x1x3x128xf32, #tpu.memory_space<vmem>>, %arg15: memref<3x32xf32, #tpu.memory_space<vmem>>) attributes {dimension_semantics = [#tpu.dimension_semantics<parallel>, #tpu.dimension_semantics<arbitrary>], iteration_bounds = array<i64: 2, 2>, scalar_prefetch = 0 : i64, scratch_operands = 1 : i64, tpu.core_type = #tpu.core_type<tc>, window_params = [{transform_indices = @transform_0, window_bounds = array<i64: 1, 3, 32>}, {transform_indices = @transform_1, window_bounds = array<i64: 1, 1, 16, 32>}, {pipeline_mode = #tpu.pipeline_mode<synchronous>, transform_indices = @transform_2, window_bounds = array<i64: 32, 129>}, {pipeline_mode = #tpu.pipeline_mode<synchronous>, transform_indices = @transform_3, window_bounds = array<i64: 1, 129>}, {pipeline_mode = #tpu.pipeline_mode<synchronous>, transform_indices = @transform_4, window_bounds = array<i64: 32, 96>}, {pipeline_mode = #tpu.pipeline_mode<synchronous>, transform_indices = @transform_5, window_bounds = array<i64: 1, 96>}, {pipeline_mode = #tpu.pipeline_mode<synchronous>, transform_indices = @transform_6, window_bounds = array<i64: 32, 64>}, {pipeline_mode = #tpu.pipeline_mode<synchronous>, transform_indices = @transform_7, window_bounds = array<i64: 1, 64>}, {pipeline_mode = #tpu.pipeline_mode<synchronous>, transform_indices = @transform_8, window_bounds = array<i64: 32, 48>}, {pipeline_mode = #tpu.pipeline_mode<synchronous>, transform_indices = @transform_9, window_bounds = array<i64: 1, 48>}, {pipeline_mode = #tpu.pipeline_mode<synchronous>, transform_indices = @transform_10, window_bounds = array<i64: 48, 72>}, {pipeline_mode = #tpu.pipeline_mode<synchronous>, transform_indices = @transform_11, window_bounds = array<i64: 1, 72>}, {transform_indices = @transform_12, window_bounds = array<i64: 1, 1, 3, 128>}]} {
    %c0_i32 = arith.constant 0 : i32
    %0 = arith.cmpi eq, %arg1, %c0_i32 : i32
    %1 = arith.extui %0 : i1 to i32
    %c0_i32_0 = arith.constant 0 : i32
    %2 = arith.cmpi ne, %1, %c0_i32_0 : i32
    scf.if %2 {
      %c0_123 = arith.constant 0 : index
      %c0_124 = arith.constant 0 : index
      %c0_125 = arith.constant 0 : index
      %351 = vector.load %arg2[%c0_123, %c0_124, %c0_125] : memref<1x3x32xf32, #tpu.memory_space<vmem>>, vector<1x3x32xf32>
      %352 = vector.shape_cast %351 : vector<1x3x32xf32> to vector<3x32xf32>
      %c0_126 = arith.constant 0 : index
      %c0_127 = arith.constant 0 : index
      %353 = vector.load %arg15[%c0_126, %c0_127] : memref<3x32xf32, #tpu.memory_space<vmem>>, vector<3x32xf32>
      tpu.vector_store %arg15[%c0_126, %c0_127], %352 {strides = array<i32>} : memref<3x32xf32, #tpu.memory_space<vmem>>, vector<3x32xf32>,
    } else {
    }
    %c0 = arith.constant 0 : index
    %c0_1 = arith.constant 0 : index
    %3 = vector.load %arg15[%c0, %c0_1] : memref<3x32xf32, #tpu.memory_space<vmem>>, vector<3x32xf32>
    %c0_2 = arith.constant 0 : index
    %c0_3 = arith.constant 0 : index
    %c0_4 = arith.constant 0 : index
    %c0_5 = arith.constant 0 : index
    %4 = vector.load %arg3[%c0_2, %c0_3, %c0_4, %c0_5] : memref<1x1x16x32xf32, #tpu.memory_space<vmem>>, vector<1x1x16x32xf32>
    %5 = vector.shape_cast %4 : vector<1x1x16x32xf32> to vector<16x32xf32>
    %c0_6 = arith.constant 0 : index
    %c0_7 = arith.constant 0 : index
    %6 = vector.load %arg4[%c0_6, %c0_7] : memref<32x129xf32, #tpu.memory_space<vmem>>, vector<32x129xf32>
    %cst = arith.constant dense<0.000000e+00> : vector<3x129xf32>
    %7 = tpu.matmul %3, %6, %cst {dimension_numbers = #tpu.dot_dimension_numbers<[1], [0], [0], [1], [0, 0, 1, 1], [], []>} : vector<3x32xf32>, vector<32x129xf32>, vector<3x129xf32> -> vector<3x129xf32>
    %c0_8 = arith.constant 0 : index
    %c0_9 = arith.constant 0 : index
    %8 = vector.load %arg5[%c0_8, %c0_9] : memref<1x129xf32, #tpu.memory_space<vmem>>, vector<1x129xf32>
    %9 = vector.broadcast %8 : vector<1x129xf32> to vector<3x129xf32>
    %10 = arith.addf %7, %9 : vector<3x129xf32>
    %c0_10 = arith.constant 0 : index
    %c0_11 = arith.constant 0 : index
    %11 = vector.load %arg6[%c0_10, %c0_11] : memref<32x96xf32, #tpu.memory_space<vmem>>, vector<32x96xf32>
    %c0_12 = arith.constant 0 : index
    %c0_13 = arith.constant 0 : index
    %12 = vector.load %arg7[%c0_12, %c0_13] : memref<1x96xf32, #tpu.memory_space<vmem>>, vector<1x96xf32>
    %c0_14 = arith.constant 0 : index
    %c0_15 = arith.constant 0 : index
    %13 = vector.load %arg8[%c0_14, %c0_15] : memref<32x64xf32, #tpu.memory_space<vmem>>, vector<32x64xf32>
    %c0_16 = arith.constant 0 : index
    %c0_17 = arith.constant 0 : index
    %14 = vector.load %arg9[%c0_16, %c0_17] : memref<1x64xf32, #tpu.memory_space<vmem>>, vector<1x64xf32>
    %15 = vector.extract_strided_slice %10 {offsets = [0, 0], sizes = [1, 129], strides = [1, 1]} : vector<3x129xf32> to vector<1x129xf32>
    %16 = vector.extract_strided_slice %15 {offsets = [0, 0], sizes = [1, 32], strides = [1, 1]} : vector<1x129xf32> to vector<1x32xf32>
    %17 = vector.extract_strided_slice %15 {offsets = [0, 32], sizes = [1, 96], strides = [1, 1]} : vector<1x129xf32> to vector<1x96xf32>
    %18 = vector.extract_strided_slice %15 {offsets = [0, 128], sizes = [1, 1], strides = [1, 1]} : vector<1x129xf32> to vector<1x1xf32>
    %cst_18 = arith.constant 0.000000e+00 : f32
    %19 = vector.broadcast %cst_18 : f32 to vector<1x1xf32>
    %20 = arith.maximumf %18, %19 : vector<1x1xf32>
    %21 = math.absf %18 : vector<1x1xf32>
    %cst_19 = arith.constant 0.000000e+00 : f32
    %22 = vector.broadcast %cst_19 : f32 to vector<1x1xf32>
    %23 = arith.subf %22, %21 : vector<1x1xf32>
    %24 = math.exp %23 : vector<1x1xf32>
    %25 = math.log1p %24 : vector<1x1xf32>
    %26 = arith.addf %20, %25 : vector<1x1xf32>
    %cst_20 = arith.constant 1.000000e+00 : f32
    %27 = vector.broadcast %cst_20 : f32 to vector<1x1xf32>
    %28 = arith.addf %26, %27 : vector<1x1xf32>
    %cst_21 = arith.constant dense<0.000000e+00> : vector<16x1xf32>
    %29 = tpu.matmul %5, %16, %cst_21 {dimension_numbers = #tpu.dot_dimension_numbers<[1], [1], [0], [0], [0, 0, 1, 0], [], []>} : vector<16x32xf32>, vector<1x32xf32>, vector<16x1xf32> -> vector<16x1xf32>
    %30 = arith.mulf %5, %5 : vector<16x32xf32>
    %cst_22 = arith.constant dense<0.000000e+00> : vector<16xf32>
    %31 = vector.multi_reduction <add>, %30, %cst_22 [1] : vector<16x32xf32> to vector<16xf32>
    %32 = vector.shape_cast %31 : vector<16xf32> to vector<16x1xf32>
    %33 = math.sqrt %32 : vector<16x1xf32>
    %34 = arith.mulf %16, %16 : vector<1x32xf32>
    %cst_23 = arith.constant dense<0.000000e+00> : vector<1xf32>
    %35 = vector.multi_reduction <add>, %34, %cst_23 [1] : vector<1x32xf32> to vector<1xf32>
    %36 = vector.shape_cast %35 : vector<1xf32> to vector<1x1xf32>
    %37 = math.sqrt %36 : vector<1x1xf32>
    %cst_24 = arith.constant 9.99999993E-9 : f32
    %38 = vector.broadcast %cst_24 : f32 to vector<16x1xf32>
    %39 = arith.maximumf %33, %38 : vector<16x1xf32>
    %cst_25 = arith.constant 9.99999993E-9 : f32
    %40 = vector.broadcast %cst_25 : f32 to vector<1x1xf32>
    %41 = arith.maximumf %37, %40 : vector<1x1xf32>
    %42 = vector.broadcast %41 : vector<1x1xf32> to vector<16x1xf32>
    %43 = arith.mulf %39, %42 : vector<16x1xf32>
    %44 = tpu.reciprocal %43 {approx = true} : vector<16x1xf32> -> vector<16x1xf32>
    %45 = arith.mulf %29, %44 : vector<16x1xf32>
    %46 = vector.broadcast %28 : vector<1x1xf32> to vector<16x1xf32>
    %47 = arith.mulf %45, %46 : vector<16x1xf32>
    %cst_26 = arith.constant dense<0xFF800000> : vector<1xf32>
    %48 = vector.multi_reduction <maximumf>, %47, %cst_26 [0] : vector<16x1xf32> to vector<1xf32>
    %49 = vector.shape_cast %48 : vector<1xf32> to vector<1x1xf32>
    %50 = vector.broadcast %49 : vector<1x1xf32> to vector<16x1xf32>
    %51 = arith.subf %47, %50 : vector<16x1xf32>
    %52 = math.exp %51 : vector<16x1xf32>
    %cst_27 = arith.constant dense<0.000000e+00> : vector<1xf32>
    %53 = vector.multi_reduction <add>, %52, %cst_27 [0] : vector<16x1xf32> to vector<1xf32>
    %54 = vector.shape_cast %53 : vector<1xf32> to vector<1x1xf32>
    %55 = tpu.reciprocal %54 {approx = true} : vector<1x1xf32> -> vector<1x1xf32>
    %56 = vector.broadcast %55 : vector<1x1xf32> to vector<16x1xf32>
    %57 = arith.mulf %52, %56 : vector<16x1xf32>
    %58 = vector.broadcast %57 : vector<16x1xf32> to vector<16x32xf32>
    %59 = arith.mulf %58, %5 : vector<16x32xf32>
    %cst_28 = arith.constant dense<0.000000e+00> : vector<32xf32>
    %60 = vector.multi_reduction <add>, %59, %cst_28 [0] : vector<16x32xf32> to vector<32xf32>
    %61 = vector.shape_cast %60 : vector<32xf32> to vector<1x32xf32>
    %cst_29 = arith.constant dense<0.000000e+00> : vector<1x96xf32>
    %62 = tpu.matmul %61, %11, %cst_29 {dimension_numbers = #tpu.dot_dimension_numbers<[1], [0], [0], [1], [0, 0, 1, 1], [], []>} : vector<1x32xf32>, vector<32x96xf32>, vector<1x96xf32> -> vector<1x96xf32>
    %63 = arith.addf %62, %12 : vector<1x96xf32>
    %64 = vector.extract_strided_slice %3 {offsets = [0, 0], sizes = [1, 32], strides = [1, 1]} : vector<3x32xf32> to vector<1x32xf32>
    %65 = vector.extract_strided_slice %63 {offsets = [0, 0], sizes = [1, 32], strides = [1, 1]} : vector<1x96xf32> to vector<1x32xf32>
    %66 = vector.extract_strided_slice %63 {offsets = [0, 32], sizes = [1, 32], strides = [1, 1]} : vector<1x96xf32> to vector<1x32xf32>
    %67 = vector.extract_strided_slice %63 {offsets = [0, 64], sizes = [1, 32], strides = [1, 1]} : vector<1x96xf32> to vector<1x32xf32>
    %68 = vector.extract_strided_slice %17 {offsets = [0, 0], sizes = [1, 32], strides = [1, 1]} : vector<1x96xf32> to vector<1x32xf32>
    %69 = vector.extract_strided_slice %17 {offsets = [0, 32], sizes = [1, 32], strides = [1, 1]} : vector<1x96xf32> to vector<1x32xf32>
    %70 = vector.extract_strided_slice %17 {offsets = [0, 64], sizes = [1, 32], strides = [1, 1]} : vector<1x96xf32> to vector<1x32xf32>
    %71 = arith.addf %65, %68 : vector<1x32xf32>
    %cst_30 = arith.constant 0.000000e+00 : f32
    %72 = vector.broadcast %cst_30 : f32 to vector<1x32xf32>
    %73 = arith.subf %72, %71 : vector<1x32xf32>
    %74 = math.exp %73 : vector<1x32xf32>
    %cst_31 = arith.constant 1.000000e+00 : f32
    %75 = vector.broadcast %cst_31 : f32 to vector<1x32xf32>
    %76 = arith.addf %75, %74 : vector<1x32xf32>
    %77 = tpu.reciprocal %76 {approx = true} : vector<1x32xf32> -> vector<1x32xf32>
    %78 = arith.addf %66, %69 : vector<1x32xf32>
    %cst_32 = arith.constant 0.000000e+00 : f32
    %79 = vector.broadcast %cst_32 : f32 to vector<1x32xf32>
    %80 = arith.subf %79, %78 : vector<1x32xf32>
    %81 = math.exp %80 : vector<1x32xf32>
    %cst_33 = arith.constant 1.000000e+00 : f32
    %82 = vector.broadcast %cst_33 : f32 to vector<1x32xf32>
    %83 = arith.addf %82, %81 : vector<1x32xf32>
    %84 = tpu.reciprocal %83 {approx = true} : vector<1x32xf32> -> vector<1x32xf32>
    %85 = arith.mulf %77, %70 : vector<1x32xf32>
    %86 = arith.addf %67, %85 : vector<1x32xf32>
    %87 = math.tanh %86 : vector<1x32xf32>
    %cst_34 = arith.constant 1.000000e+00 : f32
    %88 = vector.broadcast %cst_34 : f32 to vector<1x32xf32>
    %89 = arith.subf %88, %84 : vector<1x32xf32>
    %90 = arith.mulf %89, %87 : vector<1x32xf32>
    %91 = arith.mulf %84, %64 : vector<1x32xf32>
    %92 = arith.addf %90, %91 : vector<1x32xf32>
    %cst_35 = arith.constant dense<0.000000e+00> : vector<1x64xf32>
    %93 = tpu.matmul %92, %13, %cst_35 {dimension_numbers = #tpu.dot_dimension_numbers<[1], [0], [0], [1], [0, 0, 1, 1], [], []>} : vector<1x32xf32>, vector<32x64xf32>, vector<1x64xf32> -> vector<1x64xf32>
    %94 = arith.addf %93, %14 : vector<1x64xf32>
    %95 = vector.extract_strided_slice %94 {offsets = [0, 0], sizes = [1, 32], strides = [1, 1]} : vector<1x64xf32> to vector<1x32xf32>
    %cst_36 = arith.constant 0.000000e+00 : f32
    %96 = vector.broadcast %cst_36 : f32 to vector<1x32xf32>
    %97 = arith.subf %96, %95 : vector<1x32xf32>
    %98 = math.exp %97 : vector<1x32xf32>
    %cst_37 = arith.constant 1.000000e+00 : f32
    %99 = vector.broadcast %cst_37 : f32 to vector<1x32xf32>
    %100 = arith.addf %99, %98 : vector<1x32xf32>
    %101 = tpu.reciprocal %100 {approx = true} : vector<1x32xf32> -> vector<1x32xf32>
    %102 = vector.extract_strided_slice %94 {offsets = [0, 32], sizes = [1, 32], strides = [1, 1]} : vector<1x64xf32> to vector<1x32xf32>
    %103 = vector.broadcast %57 : vector<16x1xf32> to vector<16x32xf32>
    %104 = vector.broadcast %101 : vector<1x32xf32> to vector<16x32xf32>
    %105 = arith.mulf %103, %104 : vector<16x32xf32>
    %cst_38 = arith.constant 1.000000e+00 : f32
    %106 = vector.broadcast %cst_38 : f32 to vector<16x32xf32>
    %107 = arith.subf %106, %105 : vector<16x32xf32>
    %108 = arith.mulf %5, %107 : vector<16x32xf32>
    %109 = vector.broadcast %57 : vector<16x1xf32> to vector<16x32xf32>
    %110 = vector.broadcast %102 : vector<1x32xf32> to vector<16x32xf32>
    %111 = arith.mulf %109, %110 : vector<16x32xf32>
    %112 = arith.addf %108, %111 : vector<16x32xf32>
    %c0_39 = arith.constant 0 : index
    %c0_40 = arith.constant 0 : index
    %113 = vector.load %arg15[%c0_39, %c0_40] : memref<3x32xf32, #tpu.memory_space<vmem>>, vector<1x32xf32>
    tpu.vector_store %arg15[%c0_39, %c0_40], %92 {strides = array<i32>} : memref<3x32xf32, #tpu.memory_space<vmem>>, vector<1x32xf32>,
    %114 = vector.extract_strided_slice %10 {offsets = [1, 0], sizes = [1, 129], strides = [1, 1]} : vector<3x129xf32> to vector<1x129xf32>
    %115 = vector.extract_strided_slice %114 {offsets = [0, 0], sizes = [1, 32], strides = [1, 1]} : vector<1x129xf32> to vector<1x32xf32>
    %116 = vector.extract_strided_slice %114 {offsets = [0, 32], sizes = [1, 96], strides = [1, 1]} : vector<1x129xf32> to vector<1x96xf32>
    %117 = vector.extract_strided_slice %114 {offsets = [0, 128], sizes = [1, 1], strides = [1, 1]} : vector<1x129xf32> to vector<1x1xf32>
    %cst_41 = arith.constant 0.000000e+00 : f32
    %118 = vector.broadcast %cst_41 : f32 to vector<1x1xf32>
    %119 = arith.maximumf %117, %118 : vector<1x1xf32>
    %120 = math.absf %117 : vector<1x1xf32>
    %cst_42 = arith.constant 0.000000e+00 : f32
    %121 = vector.broadcast %cst_42 : f32 to vector<1x1xf32>
    %122 = arith.subf %121, %120 : vector<1x1xf32>
    %123 = math.exp %122 : vector<1x1xf32>
    %124 = math.log1p %123 : vector<1x1xf32>
    %125 = arith.addf %119, %124 : vector<1x1xf32>
    %cst_43 = arith.constant 1.000000e+00 : f32
    %126 = vector.broadcast %cst_43 : f32 to vector<1x1xf32>
    %127 = arith.addf %125, %126 : vector<1x1xf32>
    %cst_44 = arith.constant dense<0.000000e+00> : vector<16x1xf32>
    %128 = tpu.matmul %112, %115, %cst_44 {dimension_numbers = #tpu.dot_dimension_numbers<[1], [1], [0], [0], [0, 0, 1, 0], [], []>} : vector<16x32xf32>, vector<1x32xf32>, vector<16x1xf32> -> vector<16x1xf32>
    %129 = arith.mulf %112, %112 : vector<16x32xf32>
    %cst_45 = arith.constant dense<0.000000e+00> : vector<16xf32>
    %130 = vector.multi_reduction <add>, %129, %cst_45 [1] : vector<16x32xf32> to vector<16xf32>
    %131 = vector.shape_cast %130 : vector<16xf32> to vector<16x1xf32>
    %132 = math.sqrt %131 : vector<16x1xf32>
    %133 = arith.mulf %115, %115 : vector<1x32xf32>
    %cst_46 = arith.constant dense<0.000000e+00> : vector<1xf32>
    %134 = vector.multi_reduction <add>, %133, %cst_46 [1] : vector<1x32xf32> to vector<1xf32>
    %135 = vector.shape_cast %134 : vector<1xf32> to vector<1x1xf32>
    %136 = math.sqrt %135 : vector<1x1xf32>
    %cst_47 = arith.constant 9.99999993E-9 : f32
    %137 = vector.broadcast %cst_47 : f32 to vector<16x1xf32>
    %138 = arith.maximumf %132, %137 : vector<16x1xf32>
    %cst_48 = arith.constant 9.99999993E-9 : f32
    %139 = vector.broadcast %cst_48 : f32 to vector<1x1xf32>
    %140 = arith.maximumf %136, %139 : vector<1x1xf32>
    %141 = vector.broadcast %140 : vector<1x1xf32> to vector<16x1xf32>
    %142 = arith.mulf %138, %141 : vector<16x1xf32>
    %143 = tpu.reciprocal %142 {approx = true} : vector<16x1xf32> -> vector<16x1xf32>
    %144 = arith.mulf %128, %143 : vector<16x1xf32>
    %145 = vector.broadcast %127 : vector<1x1xf32> to vector<16x1xf32>
    %146 = arith.mulf %144, %145 : vector<16x1xf32>
    %cst_49 = arith.constant dense<0xFF800000> : vector<1xf32>
    %147 = vector.multi_reduction <maximumf>, %146, %cst_49 [0] : vector<16x1xf32> to vector<1xf32>
    %148 = vector.shape_cast %147 : vector<1xf32> to vector<1x1xf32>
    %149 = vector.broadcast %148 : vector<1x1xf32> to vector<16x1xf32>
    %150 = arith.subf %146, %149 : vector<16x1xf32>
    %151 = math.exp %150 : vector<16x1xf32>
    %cst_50 = arith.constant dense<0.000000e+00> : vector<1xf32>
    %152 = vector.multi_reduction <add>, %151, %cst_50 [0] : vector<16x1xf32> to vector<1xf32>
    %153 = vector.shape_cast %152 : vector<1xf32> to vector<1x1xf32>
    %154 = tpu.reciprocal %153 {approx = true} : vector<1x1xf32> -> vector<1x1xf32>
    %155 = vector.broadcast %154 : vector<1x1xf32> to vector<16x1xf32>
    %156 = arith.mulf %151, %155 : vector<16x1xf32>
    %157 = vector.broadcast %156 : vector<16x1xf32> to vector<16x32xf32>
    %158 = arith.mulf %157, %112 : vector<16x32xf32>
    %cst_51 = arith.constant dense<0.000000e+00> : vector<32xf32>
    %159 = vector.multi_reduction <add>, %158, %cst_51 [0] : vector<16x32xf32> to vector<32xf32>
    %160 = vector.shape_cast %159 : vector<32xf32> to vector<1x32xf32>
    %cst_52 = arith.constant dense<0.000000e+00> : vector<1x96xf32>
    %161 = tpu.matmul %160, %11, %cst_52 {dimension_numbers = #tpu.dot_dimension_numbers<[1], [0], [0], [1], [0, 0, 1, 1], [], []>} : vector<1x32xf32>, vector<32x96xf32>, vector<1x96xf32> -> vector<1x96xf32>
    %162 = arith.addf %161, %12 : vector<1x96xf32>
    %163 = vector.extract_strided_slice %3 {offsets = [1, 0], sizes = [1, 32], strides = [1, 1]} : vector<3x32xf32> to vector<1x32xf32>
    %164 = vector.extract_strided_slice %162 {offsets = [0, 0], sizes = [1, 32], strides = [1, 1]} : vector<1x96xf32> to vector<1x32xf32>
    %165 = vector.extract_strided_slice %162 {offsets = [0, 32], sizes = [1, 32], strides = [1, 1]} : vector<1x96xf32> to vector<1x32xf32>
    %166 = vector.extract_strided_slice %162 {offsets = [0, 64], sizes = [1, 32], strides = [1, 1]} : vector<1x96xf32> to vector<1x32xf32>
    %167 = vector.extract_strided_slice %116 {offsets = [0, 0], sizes = [1, 32], strides = [1, 1]} : vector<1x96xf32> to vector<1x32xf32>
    %168 = vector.extract_strided_slice %116 {offsets = [0, 32], sizes = [1, 32], strides = [1, 1]} : vector<1x96xf32> to vector<1x32xf32>
    %169 = vector.extract_strided_slice %116 {offsets = [0, 64], sizes = [1, 32], strides = [1, 1]} : vector<1x96xf32> to vector<1x32xf32>
    %170 = arith.addf %164, %167 : vector<1x32xf32>
    %cst_53 = arith.constant 0.000000e+00 : f32
    %171 = vector.broadcast %cst_53 : f32 to vector<1x32xf32>
    %172 = arith.subf %171, %170 : vector<1x32xf32>
    %173 = math.exp %172 : vector<1x32xf32>
    %cst_54 = arith.constant 1.000000e+00 : f32
    %174 = vector.broadcast %cst_54 : f32 to vector<1x32xf32>
    %175 = arith.addf %174, %173 : vector<1x32xf32>
    %176 = tpu.reciprocal %175 {approx = true} : vector<1x32xf32> -> vector<1x32xf32>
    %177 = arith.addf %165, %168 : vector<1x32xf32>
    %cst_55 = arith.constant 0.000000e+00 : f32
    %178 = vector.broadcast %cst_55 : f32 to vector<1x32xf32>
    %179 = arith.subf %178, %177 : vector<1x32xf32>
    %180 = math.exp %179 : vector<1x32xf32>
    %cst_56 = arith.constant 1.000000e+00 : f32
    %181 = vector.broadcast %cst_56 : f32 to vector<1x32xf32>
    %182 = arith.addf %181, %180 : vector<1x32xf32>
    %183 = tpu.reciprocal %182 {approx = true} : vector<1x32xf32> -> vector<1x32xf32>
    %184 = arith.mulf %176, %169 : vector<1x32xf32>
    %185 = arith.addf %166, %184 : vector<1x32xf32>
    %186 = math.tanh %185 : vector<1x32xf32>
    %cst_57 = arith.constant 1.000000e+00 : f32
    %187 = vector.broadcast %cst_57 : f32 to vector<1x32xf32>
    %188 = arith.subf %187, %183 : vector<1x32xf32>
    %189 = arith.mulf %188, %186 : vector<1x32xf32>
    %190 = arith.mulf %183, %163 : vector<1x32xf32>
    %191 = arith.addf %189, %190 : vector<1x32xf32>
    %cst_58 = arith.constant dense<0.000000e+00> : vector<1x64xf32>
    %192 = tpu.matmul %191, %13, %cst_58 {dimension_numbers = #tpu.dot_dimension_numbers<[1], [0], [0], [1], [0, 0, 1, 1], [], []>} : vector<1x32xf32>, vector<32x64xf32>, vector<1x64xf32> -> vector<1x64xf32>
    %193 = arith.addf %192, %14 : vector<1x64xf32>
    %194 = vector.extract_strided_slice %193 {offsets = [0, 0], sizes = [1, 32], strides = [1, 1]} : vector<1x64xf32> to vector<1x32xf32>
    %cst_59 = arith.constant 0.000000e+00 : f32
    %195 = vector.broadcast %cst_59 : f32 to vector<1x32xf32>
    %196 = arith.subf %195, %194 : vector<1x32xf32>
    %197 = math.exp %196 : vector<1x32xf32>
    %cst_60 = arith.constant 1.000000e+00 : f32
    %198 = vector.broadcast %cst_60 : f32 to vector<1x32xf32>
    %199 = arith.addf %198, %197 : vector<1x32xf32>
    %200 = tpu.reciprocal %199 {approx = true} : vector<1x32xf32> -> vector<1x32xf32>
    %201 = vector.extract_strided_slice %193 {offsets = [0, 32], sizes = [1, 32], strides = [1, 1]} : vector<1x64xf32> to vector<1x32xf32>
    %202 = vector.broadcast %156 : vector<16x1xf32> to vector<16x32xf32>
    %203 = vector.broadcast %200 : vector<1x32xf32> to vector<16x32xf32>
    %204 = arith.mulf %202, %203 : vector<16x32xf32>
    %cst_61 = arith.constant 1.000000e+00 : f32
    %205 = vector.broadcast %cst_61 : f32 to vector<16x32xf32>
    %206 = arith.subf %205, %204 : vector<16x32xf32>
    %207 = arith.mulf %112, %206 : vector<16x32xf32>
    %208 = vector.broadcast %156 : vector<16x1xf32> to vector<16x32xf32>
    %209 = vector.broadcast %201 : vector<1x32xf32> to vector<16x32xf32>
    %210 = arith.mulf %208, %209 : vector<16x32xf32>
    %211 = arith.addf %207, %210 : vector<16x32xf32>
    %c1 = arith.constant 1 : index
    %c0_62 = arith.constant 0 : index
    %212 = vector.load %arg15[%c1, %c0_62] : memref<3x32xf32, #tpu.memory_space<vmem>>, vector<1x32xf32>
    tpu.vector_store %arg15[%c1, %c0_62], %191 {strides = array<i32>} : memref<3x32xf32, #tpu.memory_space<vmem>>, vector<1x32xf32>,
    %213 = vector.extract_strided_slice %10 {offsets = [2, 0], sizes = [1, 129], strides = [1, 1]} : vector<3x129xf32> to vector<1x129xf32>
    %214 = vector.extract_strided_slice %213 {offsets = [0, 0], sizes = [1, 32], strides = [1, 1]} : vector<1x129xf32> to vector<1x32xf32>
    %215 = vector.extract_strided_slice %213 {offsets = [0, 32], sizes = [1, 96], strides = [1, 1]} : vector<1x129xf32> to vector<1x96xf32>
    %216 = vector.extract_strided_slice %213 {offsets = [0, 128], sizes = [1, 1], strides = [1, 1]} : vector<1x129xf32> to vector<1x1xf32>
    %cst_63 = arith.constant 0.000000e+00 : f32
    %217 = vector.broadcast %cst_63 : f32 to vector<1x1xf32>
    %218 = arith.maximumf %216, %217 : vector<1x1xf32>
    %219 = math.absf %216 : vector<1x1xf32>
    %cst_64 = arith.constant 0.000000e+00 : f32
    %220 = vector.broadcast %cst_64 : f32 to vector<1x1xf32>
    %221 = arith.subf %220, %219 : vector<1x1xf32>
    %222 = math.exp %221 : vector<1x1xf32>
    %223 = math.log1p %222 : vector<1x1xf32>
    %224 = arith.addf %218, %223 : vector<1x1xf32>
    %cst_65 = arith.constant 1.000000e+00 : f32
    %225 = vector.broadcast %cst_65 : f32 to vector<1x1xf32>
    %226 = arith.addf %224, %225 : vector<1x1xf32>
    %cst_66 = arith.constant dense<0.000000e+00> : vector<16x1xf32>
    %227 = tpu.matmul %211, %214, %cst_66 {dimension_numbers = #tpu.dot_dimension_numbers<[1], [1], [0], [0], [0, 0, 1, 0], [], []>} : vector<16x32xf32>, vector<1x32xf32>, vector<16x1xf32> -> vector<16x1xf32>
    %228 = arith.mulf %211, %211 : vector<16x32xf32>
    %cst_67 = arith.constant dense<0.000000e+00> : vector<16xf32>
    %229 = vector.multi_reduction <add>, %228, %cst_67 [1] : vector<16x32xf32> to vector<16xf32>
    %230 = vector.shape_cast %229 : vector<16xf32> to vector<16x1xf32>
    %231 = math.sqrt %230 : vector<16x1xf32>
    %232 = arith.mulf %214, %214 : vector<1x32xf32>
    %cst_68 = arith.constant dense<0.000000e+00> : vector<1xf32>
    %233 = vector.multi_reduction <add>, %232, %cst_68 [1] : vector<1x32xf32> to vector<1xf32>
    %234 = vector.shape_cast %233 : vector<1xf32> to vector<1x1xf32>
    %235 = math.sqrt %234 : vector<1x1xf32>
    %cst_69 = arith.constant 9.99999993E-9 : f32
    %236 = vector.broadcast %cst_69 : f32 to vector<16x1xf32>
    %237 = arith.maximumf %231, %236 : vector<16x1xf32>
    %cst_70 = arith.constant 9.99999993E-9 : f32
    %238 = vector.broadcast %cst_70 : f32 to vector<1x1xf32>
    %239 = arith.maximumf %235, %238 : vector<1x1xf32>
    %240 = vector.broadcast %239 : vector<1x1xf32> to vector<16x1xf32>
    %241 = arith.mulf %237, %240 : vector<16x1xf32>
    %242 = tpu.reciprocal %241 {approx = true} : vector<16x1xf32> -> vector<16x1xf32>
    %243 = arith.mulf %227, %242 : vector<16x1xf32>
    %244 = vector.broadcast %226 : vector<1x1xf32> to vector<16x1xf32>
    %245 = arith.mulf %243, %244 : vector<16x1xf32>
    %cst_71 = arith.constant dense<0xFF800000> : vector<1xf32>
    %246 = vector.multi_reduction <maximumf>, %245, %cst_71 [0] : vector<16x1xf32> to vector<1xf32>
    %247 = vector.shape_cast %246 : vector<1xf32> to vector<1x1xf32>
    %248 = vector.broadcast %247 : vector<1x1xf32> to vector<16x1xf32>
    %249 = arith.subf %245, %248 : vector<16x1xf32>
    %250 = math.exp %249 : vector<16x1xf32>
    %cst_72 = arith.constant dense<0.000000e+00> : vector<1xf32>
    %251 = vector.multi_reduction <add>, %250, %cst_72 [0] : vector<16x1xf32> to vector<1xf32>
    %252 = vector.shape_cast %251 : vector<1xf32> to vector<1x1xf32>
    %253 = tpu.reciprocal %252 {approx = true} : vector<1x1xf32> -> vector<1x1xf32>
    %254 = vector.broadcast %253 : vector<1x1xf32> to vector<16x1xf32>
    %255 = arith.mulf %250, %254 : vector<16x1xf32>
    %256 = vector.broadcast %255 : vector<16x1xf32> to vector<16x32xf32>
    %257 = arith.mulf %256, %211 : vector<16x32xf32>
    %cst_73 = arith.constant dense<0.000000e+00> : vector<32xf32>
    %258 = vector.multi_reduction <add>, %257, %cst_73 [0] : vector<16x32xf32> to vector<32xf32>
    %259 = vector.shape_cast %258 : vector<32xf32> to vector<1x32xf32>
    %cst_74 = arith.constant dense<0.000000e+00> : vector<1x96xf32>
    %260 = tpu.matmul %259, %11, %cst_74 {dimension_numbers = #tpu.dot_dimension_numbers<[1], [0], [0], [1], [0, 0, 1, 1], [], []>} : vector<1x32xf32>, vector<32x96xf32>, vector<1x96xf32> -> vector<1x96xf32>
    %261 = arith.addf %260, %12 : vector<1x96xf32>
    %262 = vector.extract_strided_slice %3 {offsets = [2, 0], sizes = [1, 32], strides = [1, 1]} : vector<3x32xf32> to vector<1x32xf32>
    %263 = vector.extract_strided_slice %261 {offsets = [0, 0], sizes = [1, 32], strides = [1, 1]} : vector<1x96xf32> to vector<1x32xf32>
    %264 = vector.extract_strided_slice %261 {offsets = [0, 32], sizes = [1, 32], strides = [1, 1]} : vector<1x96xf32> to vector<1x32xf32>
    %265 = vector.extract_strided_slice %261 {offsets = [0, 64], sizes = [1, 32], strides = [1, 1]} : vector<1x96xf32> to vector<1x32xf32>
    %266 = vector.extract_strided_slice %215 {offsets = [0, 0], sizes = [1, 32], strides = [1, 1]} : vector<1x96xf32> to vector<1x32xf32>
    %267 = vector.extract_strided_slice %215 {offsets = [0, 32], sizes = [1, 32], strides = [1, 1]} : vector<1x96xf32> to vector<1x32xf32>
    %268 = vector.extract_strided_slice %215 {offsets = [0, 64], sizes = [1, 32], strides = [1, 1]} : vector<1x96xf32> to vector<1x32xf32>
    %269 = arith.addf %263, %266 : vector<1x32xf32>
    %cst_75 = arith.constant 0.000000e+00 : f32
    %270 = vector.broadcast %cst_75 : f32 to vector<1x32xf32>
    %271 = arith.subf %270, %269 : vector<1x32xf32>
    %272 = math.exp %271 : vector<1x32xf32>
    %cst_76 = arith.constant 1.000000e+00 : f32
    %273 = vector.broadcast %cst_76 : f32 to vector<1x32xf32>
    %274 = arith.addf %273, %272 : vector<1x32xf32>
    %275 = tpu.reciprocal %274 {approx = true} : vector<1x32xf32> -> vector<1x32xf32>
    %276 = arith.addf %264, %267 : vector<1x32xf32>
    %cst_77 = arith.constant 0.000000e+00 : f32
    %277 = vector.broadcast %cst_77 : f32 to vector<1x32xf32>
    %278 = arith.subf %277, %276 : vector<1x32xf32>
    %279 = math.exp %278 : vector<1x32xf32>
    %cst_78 = arith.constant 1.000000e+00 : f32
    %280 = vector.broadcast %cst_78 : f32 to vector<1x32xf32>
    %281 = arith.addf %280, %279 : vector<1x32xf32>
    %282 = tpu.reciprocal %281 {approx = true} : vector<1x32xf32> -> vector<1x32xf32>
    %283 = arith.mulf %275, %268 : vector<1x32xf32>
    %284 = arith.addf %265, %283 : vector<1x32xf32>
    %285 = math.tanh %284 : vector<1x32xf32>
    %cst_79 = arith.constant 1.000000e+00 : f32
    %286 = vector.broadcast %cst_79 : f32 to vector<1x32xf32>
    %287 = arith.subf %286, %282 : vector<1x32xf32>
    %288 = arith.mulf %287, %285 : vector<1x32xf32>
    %289 = arith.mulf %282, %262 : vector<1x32xf32>
    %290 = arith.addf %288, %289 : vector<1x32xf32>
    %c2 = arith.constant 2 : index
    %c0_80 = arith.constant 0 : index
    %291 = vector.load %arg15[%c2, %c0_80] : memref<3x32xf32, #tpu.memory_space<vmem>>, vector<1x32xf32>
    tpu.vector_store %arg15[%c2, %c0_80], %290 {strides = array<i32>} : memref<3x32xf32, #tpu.memory_space<vmem>>, vector<1x32xf32>,
    %c0_81 = arith.constant 0 : index
    %c0_82 = arith.constant 0 : index
    %292 = vector.load %arg15[%c0_81, %c0_82] : memref<3x32xf32, #tpu.memory_space<vmem>>, vector<3x32xf32>
    %c0_83 = arith.constant 0 : index
    %c0_84 = arith.constant 0 : index
    %293 = vector.load %arg10[%c0_83, %c0_84] : memref<32x48xf32, #tpu.memory_space<vmem>>, vector<32x48xf32>
    %cst_85 = arith.constant dense<0.000000e+00> : vector<3x48xf32>
    %294 = tpu.matmul %292, %293, %cst_85 {dimension_numbers = #tpu.dot_dimension_numbers<[1], [0], [0], [1], [0, 0, 1, 1], [], []>} : vector<3x32xf32>, vector<32x48xf32>, vector<3x48xf32> -> vector<3x48xf32>
    %c0_86 = arith.constant 0 : index
    %c0_87 = arith.constant 0 : index
    %295 = vector.load %arg11[%c0_86, %c0_87] : memref<1x48xf32, #tpu.memory_space<vmem>>, vector<1x48xf32>
    %296 = vector.broadcast %295 : vector<1x48xf32> to vector<3x48xf32>
    %297 = arith.addf %294, %296 : vector<3x48xf32>
    %cst_88 = arith.constant 0.000000e+00 : f32
    %298 = vector.broadcast %cst_88 : f32 to vector<3x48xf32>
    %299 = arith.maximumf %297, %298 : vector<3x48xf32>
    %c0_89 = arith.constant 0 : index
    %c0_90 = arith.constant 0 : index
    %300 = vector.load %arg12[%c0_89, %c0_90] : memref<48x72xf32, #tpu.memory_space<vmem>>, vector<48x72xf32>
    %cst_91 = arith.constant dense<0.000000e+00> : vector<3x72xf32>
    %301 = tpu.matmul %299, %300, %cst_91 {dimension_numbers = #tpu.dot_dimension_numbers<[1], [0], [0], [1], [0, 0, 1, 1], [], []>} : vector<3x48xf32>, vector<48x72xf32>, vector<3x72xf32> -> vector<3x72xf32>
    %c0_92 = arith.constant 0 : index
    %c0_93 = arith.constant 0 : index
    %302 = vector.load %arg13[%c0_92, %c0_93] : memref<1x72xf32, #tpu.memory_space<vmem>>, vector<1x72xf32>
    %303 = vector.broadcast %302 : vector<1x72xf32> to vector<3x72xf32>
    %304 = arith.addf %301, %303 : vector<3x72xf32>
    %305 = vector.extract_strided_slice %304 {offsets = [0, 0], sizes = [3, 1], strides = [1, 1]} : vector<3x72xf32> to vector<3x1xf32>
    %306 = vector.extract_strided_slice %304 {offsets = [0, 1], sizes = [3, 3], strides = [1, 1]} : vector<3x72xf32> to vector<3x3xf32>
    %307 = vector.extract_strided_slice %304 {offsets = [0, 4], sizes = [3, 4], strides = [1, 1]} : vector<3x72xf32> to vector<3x4xf32>
    %308 = vector.extract_strided_slice %304 {offsets = [0, 8], sizes = [3, 16], strides = [1, 1]} : vector<3x72xf32> to vector<3x16xf32>
    %309 = vector.extract_strided_slice %304 {offsets = [0, 24], sizes = [3, 48], strides = [1, 1]} : vector<3x72xf32> to vector<3x48xf32>
    %310 = math.tanh %305 : vector<3x1xf32>
    %311 = math.absf %310 : vector<3x1xf32>
    %cst_94 = arith.constant dense<0xFF800000> : vector<3xf32>
    %312 = vector.multi_reduction <maximumf>, %306, %cst_94 [1] : vector<3x3xf32> to vector<3xf32>
    %313 = vector.shape_cast %312 : vector<3xf32> to vector<3x1xf32>
    %314 = tpu.iota {dimensions = array<i32: 1>} : vector<3x3xi32>
    %315 = arith.sitofp %314 : vector<3x3xi32> to vector<3x3xf32>
    %316 = vector.broadcast %313 : vector<3x1xf32> to vector<3x3xf32>
    %317 = arith.cmpf oge, %306, %316 : vector<3x3xf32>
    %cst_95 = arith.constant 3.000000e+00 : f32
    %318 = vector.broadcast %cst_95 : f32 to vector<3x3xf32>
    %319 = arith.select %317, %315, %318 : vector<3x3xi1>, vector<3x3xf32>
    %cst_96 = arith.constant dense<0x7F800000> : vector<3xf32>
    %320 = vector.multi_reduction <minimumf>, %319, %cst_96 [1] : vector<3x3xf32> to vector<3xf32>
    %321 = vector.shape_cast %320 : vector<3xf32> to vector<3x1xf32>
    %322 = vector.broadcast %321 : vector<3x1xf32> to vector<3x3xf32>
    %323 = arith.cmpf oeq, %315, %322 : vector<3x3xf32>
    %324 = arith.extui %323 : vector<3x3xi1> to vector<3x3xi32>
    %325 = arith.sitofp %324 : vector<3x3xi32> to vector<3x3xf32>
    %326 = math.tanh %307 : vector<3x4xf32>
    %cst_97 = arith.constant 0.000000e+00 : f32
    %327 = vector.broadcast %cst_97 : f32 to vector<3x16xf32>
    %328 = arith.cmpf ogt, %308, %327 : vector<3x16xf32>
    %329 = arith.extui %328 : vector<3x16xi1> to vector<3x16xi32>
    %330 = arith.sitofp %329 : vector<3x16xi32> to vector<3x16xf32>
    %cst_98 = arith.constant 0.000000e+00 : f32
    %331 = vector.broadcast %cst_98 : f32 to vector<3x48xf32>
    %332 = arith.subf %331, %309 : vector<3x48xf32>
    %333 = math.exp %332 : vector<3x48xf32>
    %cst_99 = arith.constant 1.000000e+00 : f32
    %334 = vector.broadcast %cst_99 : f32 to vector<3x48xf32>
    %335 = arith.addf %334, %333 : vector<3x48xf32>
    %336 = tpu.reciprocal %335 {approx = true} : vector<3x48xf32> -> vector<3x48xf32>
    %337 = vector.shape_cast %292 : vector<3x32xf32> to vector<1x1x3x32xf32>
    %c0_100 = arith.constant 0 : index
    %c0_101 = arith.constant 0 : index
    %c0_102 = arith.constant 0 : index
    %c0_103 = arith.constant 0 : index
    %338 = vector.load %arg14[%c0_100, %c0_101, %c0_102, %c0_103] : memref<1x1x3x128xf32, #tpu.memory_space<vmem>>, vector<1x1x3x32xf32>
    tpu.vector_store %arg14[%c0_100, %c0_101, %c0_102, %c0_103], %337 {strides = array<i32>} : memref<1x1x3x128xf32, #tpu.memory_space<vmem>>, vector<1x1x3x32xf32>,
    %339 = vector.shape_cast %311 : vector<3x1xf32> to vector<1x1x3x1xf32>
    %c0_104 = arith.constant 0 : index
    %c0_105 = arith.constant 0 : index
    %c0_106 = arith.constant 0 : index
    %c32 = arith.constant 32 : index
    %340 = vector.load %arg14[%c0_104, %c0_105, %c0_106, %c32] : memref<1x1x3x128xf32, #tpu.memory_space<vmem>>, vector<1x1x3x1xf32>
    tpu.vector_store %arg14[%c0_104, %c0_105, %c0_106, %c32], %339 {strides = array<i32>} : memref<1x1x3x128xf32, #tpu.memory_space<vmem>>, vector<1x1x3x1xf32>,
    %341 = vector.shape_cast %325 : vector<3x3xf32> to vector<1x1x3x3xf32>
    %c0_107 = arith.constant 0 : index
    %c0_108 = arith.constant 0 : index
    %c0_109 = arith.constant 0 : index
    %c33 = arith.constant 33 : index
    %342 = vector.load %arg14[%c0_107, %c0_108, %c0_109, %c33] : memref<1x1x3x128xf32, #tpu.memory_space<vmem>>, vector<1x1x3x3xf32>
    tpu.vector_store %arg14[%c0_107, %c0_108, %c0_109, %c33], %341 {strides = array<i32>} : memref<1x1x3x128xf32, #tpu.memory_space<vmem>>, vector<1x1x3x3xf32>,
    %343 = vector.shape_cast %326 : vector<3x4xf32> to vector<1x1x3x4xf32>
    %c0_110 = arith.constant 0 : index
    %c0_111 = arith.constant 0 : index
    %c0_112 = arith.constant 0 : index
    %c36 = arith.constant 36 : index
    %344 = vector.load %arg14[%c0_110, %c0_111, %c0_112, %c36] : memref<1x1x3x128xf32, #tpu.memory_space<vmem>>, vector<1x1x3x4xf32>
    tpu.vector_store %arg14[%c0_110, %c0_111, %c0_112, %c36], %343 {strides = array<i32>} : memref<1x1x3x128xf32, #tpu.memory_space<vmem>>, vector<1x1x3x4xf32>,
    %345 = vector.shape_cast %330 : vector<3x16xf32> to vector<1x1x3x16xf32>
    %c0_113 = arith.constant 0 : index
    %c0_114 = arith.constant 0 : index
    %c0_115 = arith.constant 0 : index
    %c40 = arith.constant 40 : index
    %346 = vector.load %arg14[%c0_113, %c0_114, %c0_115, %c40] : memref<1x1x3x128xf32, #tpu.memory_space<vmem>>, vector<1x1x3x16xf32>
    tpu.vector_store %arg14[%c0_113, %c0_114, %c0_115, %c40], %345 {strides = array<i32>} : memref<1x1x3x128xf32, #tpu.memory_space<vmem>>, vector<1x1x3x16xf32>,
    %347 = vector.shape_cast %336 : vector<3x48xf32> to vector<1x1x3x48xf32>
    %c0_116 = arith.constant 0 : index
    %c0_117 = arith.constant 0 : index
    %c0_118 = arith.constant 0 : index
    %c56 = arith.constant 56 : index
    %348 = vector.load %arg14[%c0_116, %c0_117, %c0_118, %c56] : memref<1x1x3x128xf32, #tpu.memory_space<vmem>>, vector<1x1x3x48xf32>
    tpu.vector_store %arg14[%c0_116, %c0_117, %c0_118, %c56], %347 {strides = array<i32>} : memref<1x1x3x128xf32, #tpu.memory_space<vmem>>, vector<1x1x3x48xf32>,
    %cst_119 = arith.constant 0.000000e+00 : f32
    %349 = vector.broadcast %cst_119 : f32 to vector<1x1x3x24xf32>
    %c0_120 = arith.constant 0 : index
    %c0_121 = arith.constant 0 : index
    %c0_122 = arith.constant 0 : index
    %c104 = arith.constant 104 : index
    %350 = vector.load %arg14[%c0_120, %c0_121, %c0_122, %c104] : memref<1x1x3x128xf32, #tpu.memory_space<vmem>>, vector<1x1x3x24xf32>
    tpu.vector_store %arg14[%c0_120, %c0_121, %c0_122, %c104], %349 {strides = array<i32>} : memref<1x1x3x128xf32, #tpu.memory_space<vmem>>, vector<1x1x3x24xf32>,
    return
  }
  func.func @transform_0(%arg0: i32, %arg1: i32) -> (i32, i32, i32) {
    %c0_i32 = arith.constant 0 : i32
    %c0_i32_0 = arith.constant 0 : i32
    %c0_i32_1 = arith.constant 0 : i32
    return %arg0, %c0_i32, %c0_i32_0 : i32, i32, i32
  }
  func.func @transform_1(%arg0: i32, %arg1: i32) -> (i32, i32, i32, i32) {
    %c0_i32 = arith.constant 0 : i32
    %c0_i32_0 = arith.constant 0 : i32
    %c0_i32_1 = arith.constant 0 : i32
    return %arg0, %arg1, %c0_i32, %c0_i32_0 : i32, i32, i32, i32
  }
  func.func @transform_2(%arg0: i32, %arg1: i32) -> (i32, i32) {
    %c0_i32 = arith.constant 0 : i32
    %c0_i32_0 = arith.constant 0 : i32
    %c0_i32_1 = arith.constant 0 : i32
    return %c0_i32, %c0_i32_0 : i32, i32
  }
  func.func @transform_3(%arg0: i32, %arg1: i32) -> (i32, i32) {
    %c0_i32 = arith.constant 0 : i32
    %c0_i32_0 = arith.constant 0 : i32
    %c0_i32_1 = arith.constant 0 : i32
    return %c0_i32, %c0_i32_0 : i32, i32
  }
  func.func @transform_4(%arg0: i32, %arg1: i32) -> (i32, i32) {
    %c0_i32 = arith.constant 0 : i32
    %c0_i32_0 = arith.constant 0 : i32
    %c0_i32_1 = arith.constant 0 : i32
    return %c0_i32, %c0_i32_0 : i32, i32
  }
  func.func @transform_5(%arg0: i32, %arg1: i32) -> (i32, i32) {
    %c0_i32 = arith.constant 0 : i32
    %c0_i32_0 = arith.constant 0 : i32
    %c0_i32_1 = arith.constant 0 : i32
    return %c0_i32, %c0_i32_0 : i32, i32
  }
  func.func @transform_6(%arg0: i32, %arg1: i32) -> (i32, i32) {
    %c0_i32 = arith.constant 0 : i32
    %c0_i32_0 = arith.constant 0 : i32
    %c0_i32_1 = arith.constant 0 : i32
    return %c0_i32, %c0_i32_0 : i32, i32
  }
  func.func @transform_7(%arg0: i32, %arg1: i32) -> (i32, i32) {
    %c0_i32 = arith.constant 0 : i32
    %c0_i32_0 = arith.constant 0 : i32
    %c0_i32_1 = arith.constant 0 : i32
    return %c0_i32, %c0_i32_0 : i32, i32
  }
  func.func @transform_8(%arg0: i32, %arg1: i32) -> (i32, i32) {
    %c0_i32 = arith.constant 0 : i32
    %c0_i32_0 = arith.constant 0 : i32
    %c0_i32_1 = arith.constant 0 : i32
    return %c0_i32, %c0_i32_0 : i32, i32
  }
  func.func @transform_9(%arg0: i32, %arg1: i32) -> (i32, i32) {
    %c0_i32 = arith.constant 0 : i32
    %c0_i32_0 = arith.constant 0 : i32
    %c0_i32_1 = arith.constant 0 : i32
    return %c0_i32, %c0_i32_0 : i32, i32
  }
  func.func @transform_10(%arg0: i32, %arg1: i32) -> (i32, i32) {
    %c0_i32 = arith.constant 0 : i32
    %c0_i32_0 = arith.constant 0 : i32
    %c0_i32_1 = arith.constant 0 : i32
    return %c0_i32, %c0_i32_0 : i32, i32
  }
  func.func @transform_11(%arg0: i32, %arg1: i32) -> (i32, i32) {
    %c0_i32 = arith.constant 0 : i32
    %c0_i32_0 = arith.constant 0 : i32
    %c0_i32_1 = arith.constant 0 : i32
    return %c0_i32, %c0_i32_0 : i32, i32
  }
  func.func @transform_12(%arg0: i32, %arg1: i32) -> (i32, i32, i32, i32) {
    %c0_i32 = arith.constant 0 : i32
    %c0_i32_0 = arith.constant 0 : i32
    %c0_i32_1 = arith.constant 0 : i32
    return %arg0, %arg1, %c0_i32, %c0_i32_0 : i32, i32, i32, i32
  }
}

</mosaic_0001>

<bundles_post_ra>
// kernel: tracker_array_forward.1
= control target key start
LH: loop header
LB: loop body
LE: loop exit
PB: predicated region body
PF: predicated region fallthrough
CT: control target
= control target key end

     0   :  { %s3184_s0 = inlined_call_operand.vmem [shape: f32[2,3,32], index: 0, kind: input, shape index: {}]   ;;  %s3185_s1 = inlined_call_operand.hbm [shape: f32[2,2,16,32], index: 1, kind: input, shape index: {}]   ;;  %s3186_s2 = inlined_call_operand.hbm [shape: f32[32,129], index: 2, kind: input, shape index: {}]   ;;  %s3187_s3 = inlined_call_operand.vmem [shape: f32[1,129], index: 3, kind: input, shape index: {}]   ;;  %s3188_s4 = inlined_call_operand.hbm [shape: f32[32,96], index: 4, kind: input, shape index: {}]   ;;  %s3189_s5 = inlined_call_operand.vmem [shape: f32[1,96], index: 5, kind: input, shape index: {}]   ;;  %s3190_s6 = inlined_call_operand.vmem [shape: f32[32,64], index: 6, kind: input, shape index: {}]   ;;  %s3191_s7 = inlined_call_operand.vmem [shape: f32[1,64], index: 7, kind: input, shape index: {}]   ;;  %s3192_s8 = inlined_call_operand.hbm [shape: f32[32,48], index: 8, kind: input, shape index: {}]   ;;  %s3193_s9 = inlined_call_operand.vmem [shape: f32[1,48], index: 9, kind: input, shape index: {}]   ;;  %s3194_s10 = inlined_call_operand.hbm [shape: f32[48,72], index: 10, kind: input, shape index: {}]   ;;  %s3195_s11 = inlined_call_operand.vmem [shape: f32[1,72], index: 11, kind: input, shape index: {}]   ;;  %s3196_s12 = inlined_call_operand.vmem [shape: f32[2,2,3,128], index: 12, kind: output, shape index: {}]  }
   0x1   :  { %3205 = sst [smem:[#allocation15_spill]] %s3184_s0 }
   0x2   :  { %3206 = sst [smem:[#allocation16_spill]] %s3186_s2 }
   0x3   :  { %3207 = sst [smem:[#allocation17_spill]] %s3187_s3 }
   0x4   :  { %3208 = sst [smem:[#allocation18_spill]] %s3188_s4 }
   0x5   :  { %3209 = sst [smem:[#allocation19_spill]] %s3189_s5 }
   0x6   :  { %3210 = sst [smem:[#allocation20_spill]] %s3190_s6 }
   0x7   :  { %3211 = sst [smem:[#allocation21_spill]] %s3191_s7 }
   0x8   :  { %3212 = sst [smem:[#allocation22_spill]] %s3193_s9 }
   0x9   :  { %3213 = sst [smem:[#allocation23_spill]] %s3195_s11 }
   0xa   :  { %3214 = sst [smem:[#allocation24_spill]] %s3196_s12 }
   0xb   :  { %17 = vsyncpa [#allocation4], 0 }
   0xc   :  { %19 = vsyncpa [#allocation4 + $0x1], 0 }
   0xd   :  { %20 = vsyncpa [#allocation6], 0 }
   0xe   :  { %21 = vsyncpa [#allocation9], 0  ;;  %s2637_s21 = smov 0   ;;  %s2639_s22 = smov 0  }
   0xf   :  { %s2641_s23 = smov 0   ;;  %s2643_s24 = smov 0  }
  0x10   :  { %s2645_s25 = smov 0   ;;  %s2647_s26 = smov 0  }
  0x11   :  { %s2649_s27 = smov 0   ;;  %s2651_s28 = smov 0  }
  0x12 LB: > { %3215 = sst [smem:[#allocation14_spill]] %s2536_s24  ;;  %s1918_s29 = sadd.s32 4294967295, %s2552_s28   ;;  %s2552_s28 = sphi %s2651_s28, %s27_s28   ;;  %s2548_s27 = sphi %s2649_s27, %s3245_s27   ;;  %s2544_s26 = sphi %s2647_s26, %s3244_s26   ;;  %s2540_s25 = sphi %s2645_s25, %s3243_s25   ;;  %s2536_s24 = sphi %s2643_s24, %s3242_s24   ;;  %s2532_s23 = sphi %s2641_s23, %s3241_s23   ;;  %s2528_s22 = sphi %s2639_s22, %s3240_s22   ;;  %s2524_s21 = sphi %s2637_s21, %s3239_s21  }
  0x13   : > { %p87_p0 = scmp.ne.s32.totalorder %s2528_s22, %s2524_s21  ;;  %p2677_p1 = scmp.eq.s32.totalorder %s1918_s29, 0 }
  0x14   : > { %p1920_p2 = scmp.ge.s32.totalorder %s2552_s28, 1  ;;  %p336_p3 = scmp.lt.s32.totalorder %s2552_s28, 5 }
  0x15   : > { %s3216_s30 = scalar_select %p2677_p1, 1, 0 }
  0x16   : > { %p2685_p4 = por %p2677_p1, %p87_p0  ;;  %p2689_p5 = pnand %p1920_p2, %p336_p3 }
  0x17   : > { %s2554_s15 = smov [#allocation5]   ;;  %s2555_s18 = smov [#allocation8]  }
  0x18   : > { %s3217_s13 = scalar_select %p2685_p4, 1, 0 }
  0x19   : > { %s3218_s14 = scalar_select %p2689_p5, 1, 0 }
  0x1a   : > { %s348_s16 = sshll.u32 %s2554_s15, 4  ;;  %p2143_p6 = pneg %p2689_p5  ;;  %s349_s16 = int_to_ptr.vmem [resolvable:$true] %s348_s16 }
  0x1b   : > { %s386_s19 = sshll.u32 %s2555_s18, 4  ;;  %s3220_s2 = sld [smem:[#allocation16_spill]]  ;;  %s387_s19 = int_to_ptr.vmem [resolvable:$true] %s386_s19 }
  0x1c   : > { %p2697_p7 = pnand %p2143_p6, %p2677_p1 }
  0x1e   : > { %p2709_p9 = pneg %p2697_p7 }
  0x21   : > { %s2336_s29 = scalar_lea.hbm %s3220_s2, 1024 }
  0x22   : > { %p2337_p8 = scmp.ne.s32.totalorder %s3220_s2, %s2336_s29  ;;  %p2343_p12 = scmp.lt.u32.totalorder %s2336_s29, %s3220_s2 }
  0x24   : > { %p2339_p10 = pnand %p2709_p9, %p2337_p8 }
  0x26   : > { %p2340_p11 = pneg %p2339_p10 }
  0x28   : > { %p2345_p13 = pnand %p2343_p12, %p2340_p11 }
  0x2a   : > { %2348 = shalt.err (!%p2345_p13)
}
  0x2b   : > { %s2349_s18 = scalar_lea.vmem %s349_s16, 1024  ;;  %p2357_p6 = scmp.lt.s32.totalorder %s349_s16, %s349_s16 }
  0x2c   : > { %p2350_p0 = scmp.ne.s32.totalorder %s349_s16, %s2349_s18  ;;  %p2358_p1 = scmp.lt.s32.totalorder %s2349_s18, %s2349_s18 }
  0x2e   : > { %p2352_p2 = pnand %p2350_p0, %p2709_p9  ;;  %p2359_p4 = por %p2358_p1, %p2357_p6 }
  0x30   : > { %p2353_p3 = pneg %p2352_p2 }
  0x32   : > { %p2360_p5 = pnand %p2359_p4, %p2353_p3 }
  0x34   : > { %2363 = shalt.err (!%p2360_p5)
}
  0x35   : > { %s2556_s9 = smov 256   ;;  %s2557_s11 = smov 16  }
  0x36   : > { %2146 = dma.hbm_to_vmem [thread:$0]  (!%p2697_p7), %s3220_s2, 1024, %s349_s16, [#allocation6], %s2556_s9, %s2556_s9, %s2557_s11  }
  0x37   : > { %s2558_s20 = smov [#allocation7]   ;;  %s2364_s3 = scalar_lea.hbm %s3192_s8, 512 }
  0x38   : > { %s364_s21 = sshll.u32 %s2558_s20, 4  ;;  %p2365_p1 = scmp.ne.s32.totalorder %s3192_s8, %s2364_s3  ;;  %s365_s21 = int_to_ptr.vmem [resolvable:$true] %s364_s21 }
  0x39   : > { %p2371_p8 = scmp.lt.u32.totalorder %s2364_s3, %s3192_s8 }
  0x3a   : > { %p2367_p4 = pnand %p2365_p1, %p2709_p9 }
  0x3c   : > { %p2368_p5 = pneg %p2367_p4 }
  0x3e   : > { %p2373_p10 = pnand %p2371_p8, %p2368_p5 }
  0x40   : > { %2376 = shalt.err (!%p2373_p10)
}
  0x41   : > { %s2377_s16 = scalar_lea.vmem %s387_s19, 512  ;;  %p2385_p0 = scmp.lt.s32.totalorder %s387_s19, %s387_s19 }
  0x42   : > { %p2378_p11 = scmp.ne.s32.totalorder %s387_s19, %s2377_s16  ;;  %p2386_p2 = scmp.lt.s32.totalorder %s2377_s16, %s2377_s16 }
  0x44   : > { %p2380_p12 = pnand %p2378_p11, %p2709_p9  ;;  %p2387_p3 = por %p2386_p2, %p2385_p0 }
  0x46   : > { %p2381_p13 = pneg %p2380_p12 }
  0x48   : > { %p2388_p6 = pnand %p2387_p3, %p2381_p13 }
  0x4a   : > { %2391 = shalt.err (!%p2388_p6)
}
  0x4b   : > { %s3203_s5 = smov 128   ;;  %s3204_s12 = smov 8  }
  0x4c   : > { %2152 = dma.hbm_to_vmem [thread:$0]  (!%p2697_p7), %s3192_s8, 512, %s387_s19, [#allocation9], %s3203_s5, %s3203_s5, %s3204_s12  }
  0x4d   : > { %s3222_s4 = sld [smem:[#allocation18_spill]] }
  0x53   : > { %s2392_s11 = scalar_lea.hbm %s3222_s4, 512 }
  0x54   : > { %p2393_p1 = scmp.ne.s32.totalorder %s3222_s4, %s2392_s11  ;;  %p2399_p8 = scmp.lt.u32.totalorder %s2392_s11, %s3222_s4 }
  0x56   : > { %p2395_p4 = pnand %p2393_p1, %p2709_p9 }
  0x58   : > { %p2396_p5 = pneg %p2395_p4 }
  0x5a   : > { %p2401_p10 = pnand %p2399_p8, %p2396_p5 }
  0x5c   : > { %2404 = shalt.err (!%p2401_p10)
}
  0x5d   : > { %s2405_s18 = scalar_lea.vmem %s365_s21, 512  ;;  %p2413_p0 = scmp.lt.s32.totalorder %s365_s21, %s365_s21 }
  0x5e   : > { %p2406_p11 = scmp.ne.s32.totalorder %s365_s21, %s2405_s18  ;;  %p2414_p2 = scmp.lt.s32.totalorder %s2405_s18, %s2405_s18 }
  0x60   : > { %p2408_p12 = pnand %p2406_p11, %p2709_p9  ;;  %p2415_p3 = por %p2414_p2, %p2413_p0 }
  0x62   : > { %p2409_p13 = pneg %p2408_p12 }
  0x64   : > { %p2416_p6 = pnand %p2415_p3, %p2409_p13 }
  0x66   : > { %2419 = shalt.err (!%p2416_p6)
}
  0x67   : > { %2149 = dma.hbm_to_vmem [thread:$0]  (!%p2697_p7), %s3222_s4, 512, %s365_s21, [#allocation6], %s3203_s5, %s3203_s5, %s3204_s12  }
  0x68   : > { %s2561_s0 = smov [#allocation10]   ;;  %s2420_s11 = scalar_lea.hbm %s3194_s10, 768 }
  0x69   : > { %s402_s3 = sshll.u32 %s2561_s0, 4  ;;  %p2421_p1 = scmp.ne.s32.totalorder %s3194_s10, %s2420_s11  ;;  %s403_s3 = int_to_ptr.vmem [resolvable:$true] %s402_s3 }
  0x6a   : > { %p2427_p8 = scmp.lt.u32.totalorder %s2420_s11, %s3194_s10 }
  0x6b   : > { %p2423_p4 = pnand %p2421_p1, %p2709_p9 }
  0x6d   : > { %p2424_p5 = pneg %p2423_p4 }
  0x6f   : > { %p2429_p10 = pnand %p2427_p8, %p2424_p5 }
  0x71   : > { %2432 = shalt.err (!%p2429_p10)
}
  0x72   : > { %s2433_s21 = scalar_lea.vmem %s403_s3, 768  ;;  %p2441_p0 = scmp.lt.s32.totalorder %s403_s3, %s403_s3 }
  0x73   : > { %p2434_p11 = scmp.ne.s32.totalorder %s403_s3, %s2433_s21  ;;  %p2442_p2 = scmp.lt.s32.totalorder %s2433_s21, %s2433_s21 }
  0x75   : > { %p2436_p12 = pnand %p2434_p11, %p2709_p9  ;;  %p2443_p3 = por %p2442_p2, %p2441_p0 }
  0x77   : > { %p2437_p13 = pneg %p2436_p12 }
  0x79   : > { %p2444_p6 = pnand %p2443_p3, %p2437_p13 }
  0x7b   : > { %2447 = shalt.err (!%p2444_p6)
}
  0x7c   : > { %2155 = dma.hbm_to_vmem [thread:$0]  (!%p2697_p7), %s3194_s10, 768, %s403_s3, [#allocation9], %s3203_s5, %s3203_s5, %s3204_s12  }
  0x7d   : > { %s36_s15 = sadd.s32 1, %s2544_s26  ;;  %s39_s17 = sadd.s32 1, %s2548_s27 }
  0x7e   : > { %p37_p9 = scmp.ge.s32.totalorder %s36_s15, 2  ;;  %p81_p1 = scmp.ne.s32.totalorder %s2532_s23, %s2528_s22 }
  0x7f   : > { %p82_p4 = scmp.eq.s32.totalorder %s2552_s28, 0  ;;  %s74_s0 = sadd.s32 1, %s2532_s23 }
  0x80   : > { %s3247_s15 = smov (%p37_p9, %s36_s15), 0  ;;  %s3249_s17 = smov (!%p37_p9, %s39_s17), %s2548_s27 }
  0x81   : > { %s70_s16 = ssub.s32 %s2544_s26, %s3247_s15  ;;  %p41_p5 = scmp.ge.s32.totalorder %s3249_s17, 2 }
  0x82   : > { %p2799_p8 = por %p82_p4, %p81_p1  ;;  %p2164_p7 = scmp.lt.s32.totalorder %s2552_s28, 4 }
  0x83   : > { %s426_s3 = sand.u32 1, %s2532_s23   ;;  %s3251_s17 = smov (%p41_p5, %s3249_s17), 0 }
  0x84   : > { %s1926_s9 = sshll.u32 %s426_s3, 4  ;;  %s1927_s11 = sshll.u32 %s2544_s26, 1 }
  0x85   : > { %s69_s6 = ssub.s32 %s2548_s27, %s3251_s17  ;;  %s1928_s20 = sshll.u32 %s2548_s27, 2 }
  0x86   : > { %s71_s7 = sor.u32 %s70_s16, %s69_s6  ;;  %s436_s29 = sadd.s32 %s1928_s20, %s1927_s11 }
  0x87   : > { %p72_p10 = scmp.eq.s32.totalorder %s71_s7, 0  ;;  %s1929_s21 = sshll.u32 %s436_s29, 7 }
  0x88   : > { %s430_s18 = scalar_lea.vmem [#allocation3], %s1926_s9  ;;  %s2817_s4 = scalar_lea.hbm %s3185_s1, %s1929_s21 }
  0x89   : > { %s439_s19 = sshll.u32 %s430_s18, 4  ;;  %p2825_p11 = pnand %p2164_p7, %p2799_p8  ;;  %s2819_s19 = int_to_ptr.vmem [resolvable:$true] %s439_s19 }
  0x8a   : > { %s2812_s5 = scalar_select %p72_p10, %s2532_s23, %s74_s0  }
  0x8b   : > { %s2829_s0 = scalar_lea.sflag [#allocation4], %s426_s3  ;;  %s2448_s9 = scalar_lea.hbm %s2817_s4, 256 }
  0x8c   : > { %p2449_p12 = scmp.ne.s32.totalorder %s2817_s4, %s2448_s9  ;;  %p2450_p13 = pneg %p2825_p11 }
  0x8d   : > { %s2453_s24 = scalar_lea.hbm %s3185_s1, 1024  ;;  %p2454_p3 = scmp.lt.u32.totalorder %s2817_s4, %s3185_s1 }
  0x8e   : > { %p2451_p0 = pnand %p2450_p13, %p2449_p12  ;;  %p2455_p6 = scmp.lt.u32.totalorder %s2453_s24, %s2448_s9 }
  0x8f   : > { %p2457_p1 = scmp.lt.u32.totalorder %s2448_s9, %s2817_s4 }
  0x90   : > { %p2452_p2 = pneg %p2451_p0  ;;  %p2456_p9 = por %p2455_p6, %p2454_p3 }
  0x92   : > { %p2458_p4 = por %p2457_p1, %p2456_p9 }
  0x94   : > { %p2459_p5 = pnand %p2458_p4, %p2452_p2 }
  0x96   : > { %2462 = shalt.err (!%p2459_p5)
}
  0x97   : > { %s2463_s3 = scalar_lea.vmem %s2819_s19, 256  ;;  %s2562_s7 = smov [#allocation3]  }
  0x98   : > { %p2464_p8 = scmp.ne.s32.totalorder %s2819_s19, %s2463_s3  ;;  %s2468_s20 = sshll.u32 %s2562_s7, 4  ;;  %s2469_s20 = int_to_ptr.vmem [resolvable:$false] %s2468_s20 }
  0x99   : > { %s2470_s29 = scalar_lea.vmem %s2469_s20, 512  ;;  %p2471_p12 = scmp.lt.s32.totalorder %s2819_s19, %s2469_s20 }
  0x9a   : > { %p2466_p7 = pnand %p2464_p8, %p2450_p13  ;;  %p2472_p0 = scmp.lt.s32.totalorder %s2470_s29, %s2463_s3 }
  0x9c   : > { %p2467_p10 = pneg %p2466_p7  ;;  %p2473_p3 = por %p2472_p0, %p2471_p12 }
  0x9e   : > { %p2474_p6 = pnand %p2473_p3, %p2467_p10 }
  0xa0   : > { %2477 = shalt.err (!%p2474_p6)
}
  0xa1   : > { %s3225_s21 = smov 8   ;;  %s3226_s18 = smov 128  }
  0xa2   : > { %2159 = dma.hbm_to_vmem [thread:$0]  (!%p2825_p11), %s2817_s4, 256, %s2819_s19, %s2829_s0, %s3226_s18, %s3226_s18, %s3225_s21  }
  0xa3   : > { %p3227_p13 = scmp.ne.s32.totalorder %s3218_s14, 0 }
  0xa4   : > { %s453_s9 = sand.u32 (!%p3227_p13), 1, %s2528_s22   ;;  %p3228_p2 = scmp.ne.s32.totalorder (!%p3227_p13), %s3217_s13, 0 }
  0xa5   : > { %451 = sbr.rel (%p3227_p13) target bundleno = 4927 (0x133f), region = 68  ;;  %s2863_s2 = sshll.u32 (!%p3227_p13), %s453_s9, 4 }
  0xa6   : > { %s454_s12 = scalar_lea.sflag (!%p3227_p13), [#allocation4], %s453_s9  ;;  %s457_s24 = scalar_lea.vmem (!%p3227_p13), [#allocation3], %s2863_s2 }
  0xac   : > { %2511 = dma.done.wait (%p3228_p2), %s454_s12, 256  }
  0xad   : > { %2513 = vsyncadd (%p3228_p2), %s454_s12, 4294967040  ;;  %p3229_p9 = scmp.ne.s32.totalorder %s3216_s30, 0 }
  0xaf   : > { %2515 = dma.done.wait (%p3229_p9), [#allocation6], 1536  }
  0xb0   : > { %2517 = vsyncadd (%p3229_p9), [#allocation6], 4294965760 }
  0xb1   : > { %2519 = dma.done.wait (%p3229_p9), [#allocation9], 1280  }
  0xb2   : > { %2521 = vsyncadd (%p3229_p9), [#allocation9], 4294966016  ;;  %s3230_s4 = sld [smem:[#allocation14_spill]]  ;;  %p521_p11 = scmp.lt.s32.totalorder %s2540_s25, 1 }
  0xb3   : > { %s3231_s11 = sld [smem:[#allocation15_spill]]  ;;  %s3232_s30 = sld [smem:[#allocation24_spill]] }
  0xb4   : > { %s3253_s25 = smov (!%p521_p11, %s2540_s25), 1 }
  0xb5   : > { %s1936_s14 = sshll.u32 %s3253_s25, 2  ;;  %s1937_s19 = sshll.u32 %s3253_s25, 1 }
  0xb8   : > { %p527_p1 = scmp.lt.s32.totalorder %s3230_s4, 1  ;;  %p1939_p4 = scmp.ne.s32.totalorder %s3230_s4, 0 }
  0xb9   : > { %s524_s6 = scalar_lea.vmem %s3231_s11, %s1936_s14  ;;  %vm538_vm0 = vcmask (!%p1939_p4), 256000  }
  0xba   : > { %s528_s13 = scalar_select %p527_p1, %s3230_s4, 1 }
  0xbb   : > { %536 = sbr.rel (%p1939_p4) target bundleno = 194 (0xc2), region = 92  ;;  %v537_v0 = vld [vmem:[%s524_s6] sm:$0x7] (!%p1939_p4) }
  0xbc   : > { %s530_s3 = sadd.s32 %s1937_s19, %s528_s13  ;;  %539 = vst.msk [vmem:[#allocation2] sm:$0x7] (!%p1939_p4), %vm538_vm0, %v537_v0 }
  0xbd   : > { %s1938_s7 = sshll.u32 %s530_s3, 2 }
  0xbe   : > { %s2888_s21 = scalar_lea.vmem %s3232_s30, %s1938_s7 }
  0xc2 PF: > { %v544_v1 = vld [vmem:[#allocation5 + $0x8] sm:$0xff]  ;;  %v546_v2 = vld [vmem:[#allocation5 + $0x18] sm:$0xff]  ;;  %v543_v3 = vld [vmem:[#allocation5] sm:$0xff]  ;;  %v2563_v8 = vmov 0.0   ;;  %vm563_vm1 = vcmask 261120   ;;  %v553_v18 = vlaneseq  ;;  %s3233_s9 = sld [smem:[#allocation17_spill]] }
  0xc3   : > { %v2072_v4 = vpack.c.bf16 %v546_v2, %v544_v1  ;;  %v545_v5 = vld [vmem:[#allocation5 + $0x10] sm:$0xff]  ;;  %v548_v6 = vld [vmem:[#allocation5 + $0x28] sm:$0xff]  ;;  %v550_v7 = vld [vmem:[#allocation5 + $0x38] sm:$0xff]  ;;  %631 = vmatprep.mubr.f32.mxu0 %v2563_v8  ;;  %vm699_vm2 = vcmask 253952   ;;  %v2564_v36 = vmov 0   ;;  %vm729_vm10 = vcmask 7168  }
  0xc4   : > { %v2074_v9 = vpack.c.bf16 %v545_v5, %v543_v3  ;;  %v2076_v10 = vpack.c.bf16 %v550_v7, %v548_v6  ;;  %v547_v11 = vld [vmem:[#allocation5 + $0x20] sm:$0xff]  ;;  %v549_v12 = vld [vmem:[#allocation5 + $0x30] sm:$0xff]  ;;  %v2894_v13 = vld [vmem:[%s457_s24 + $0x8] sm:$0xff]  ;;  %v2904_v19 = vshrl.u32 %v553_v18, 7  ;;  %2251 = vset.pattern.permute.xlu0 %v2564_v36  ;;  %2250 = vset.pattern.permute.xlu1 %v2564_v36  ;;  %s2565_s2 = smov 96   ;;  %s2566_s12 = smov 32  }
  0xc5   : > { %2073 = vmatprep.subr.bf16.mxu0 %v2072_v4  ;;  %v2078_v14 = vpack.c.bf16 %v549_v12, %v547_v11  ;;  %v677_v15 = vmul.f32 %v2894_v13, %v2894_v13  ;;  %v2899_v17 = vld [vmem:[#allocation2] sm:$0x7]  ;;  %v2917_v26 = vld [vmem:[%s457_s24] sm:$0xff]  ;;  %vm2568_vm11 = vmmov 0   ;;  %vm1024_vm12 = vcmask 254977   ;;  %s3234_s13 = sld [smem:[#allocation19_spill]] }
  0xc6   : > { %2075 = vmatpush1.bf16.msra.mxu0 %v2074_v9  ;;  %v2907_v20 = vsub.s32 0, %v2904_v19  ;;  %v676_v29 = vmul.f32 %v2917_v26, %v2917_v26  ;;  %v2935_v37 = vsub.s32 1, %v2904_v19  ;;  %1999 = vmatprep.mubr.msk.f32.mxu1 %vm2568_vm11, %v2563_v8  ;;  %s2569_s14 = smov 64   ;;  %s3235_s0 = sld [smem:[#allocation20_spill]] }
  0xc7   : > { %2077 = vmatprep.subr.bf16.mxu0 %v2076_v10  ;;  %v681_v16 = vsel %vm563_vm1, %v677_v15, 0.0  ;;  %s3236_s18 = sld [smem:[#allocation21_spill]]  ;;  %s3237_s4 = sld [smem:[#allocation22_spill]] }
  0xc8   : > { %682 = vadd.xlane.f32.xlu1 %v681_v16  ;;  %v551_v21 = vld [vmem:[%s3233_s9] sm:$0x3]  ;;  %v678_v33 = vsel %vm563_vm1, %v676_v29, 0.0  ;;  %s3238_s19 = sld [smem:[#allocation23_spill]]  ;;  %s2571_s16 = smov 33  }
  0xc9   : > { %v556_v22 = vrot.slane %v551_v21, %v2907_v20  ;;  %v560_v38 = vrot.slane %v551_v21, %v2935_v37 }
  0xca   : > { %2079 = vmatpush1.bf16.msra.mxu0 %v2078_v14 }
  0xcd   : > { %1940 = vmatmul.mubr.msk.f32.vlgmr.msra.gmra.mrb[0].mxu0 %vm563_vm1, %v2899_v17 }
  0xce   : > { %2010 = vmatprep.mubr.msk.f32.mxu0 %vm2568_vm11, %v2563_v8 }
 0x155   : > { %v683_v43 = vpop.xlane.xlu1 %682 }
 0x156   : > { %vm693_vm3 = vcmp.eq.f32.partialorder %v683_v43, inf  ;;  %v696_v50 = vand.u32 2147483648, %v683_v43  ;;  %vm695_vm4 = vcmp.eq.f32.partialorder %v683_v43, 0.0 }
 0x1a0   : > { %v633_v23 = vpop.f32.mrb[0].mxu0 }
 0x1a1   : > { %v2913_v24 = vadd.f32 %v633_v23, %v556_v22  ;;  %v635_v25 = vpop.f32.mrb[1].mxu0 }
 0x1a2   : > { %v636_v39 = vadd.f32 %v635_v25, %v560_v38 }
 0x1a3   : > { %v2921_v27 = vmul.f32 %v2913_v24, %v2913_v24  ;;  %v667_v28 = vrot.slane %v2913_v24, %v2907_v20 }
 0x1a4   : > { %v649_v40 = vand.u32 2147483647, %v636_v39  ;;  %v648_v14 = vmax.f32 %v636_v39, 0.0 }
 0x1a5   : > { %v700_v30 = vsel %vm699_vm2, %v2921_v27, 0.0  ;;  %v668_v31 = vmul.f32 %v667_v28, %v2917_v26  ;;  %v669_v34 = vmul.f32 %v667_v28, %v2894_v13 }
 0x1a6   : > { %701 = vadd.xlane.f32.xlu0 %v700_v30  ;;  %v650_v41 = vsub.f32 0.0, %v649_v40 }
 0x1a7   : > { %v670_v32 = vsel %vm563_vm1, %v668_v31, 0.0  ;;  %v673_v35 = vsel %vm563_vm1, %v669_v34, 0.0 }
 0x1a8   : > { %671 = vadd.xlane.f32.xlu1 %v670_v32  ;;  %v651_v42 = vmul.f32 1.442695, %v650_v41 }
 0x1aa   : > { %679 = vadd.xlane.f32.xlu0 %v678_v33  ;;  %2252 = vpow2.f32 %v651_v42 }
 0x1ab   : > { %2254 = vrsqrt.f32 %v683_v43 }
 0x1ae   : > { %674 = vadd.xlane.f32.xlu0 %v673_v35 }
 0x1b4   : > { %v2253_v44 = vpop.eup %2252 }
 0x1b5   : > { %v653_v45 = vadd.f32 1.0, %v2253_v44  ;;  %v2255_v47 = vpop.eup %2254  ;;  %v656_v53 = vmul.f32 -0.5, %v2253_v44  ;;  %v659_v0 = vand.u32 2147483647, %v2253_v44 }
 0x1b6   : > { %v692_v49 = vmul.f32 %v2255_v47, %v683_v43 }
 0x1b7   : > { %v657_v61 = vadd.f32 1.0, %v656_v53  ;;  %vm660_vm9 = vcmp.lt.f32.partialorder %v659_v0, 0.0004427343  ;;  %v2567_v0 = vmov 0.0|0.0  }
 0x1b8   : > { %v694_v52 = vsel %vm693_vm3, %v683_v43, %v692_v49  ;;  %2080 = vmatprep.subr.bf16.mxu1 %v2567_v0  ;;  %2086 = vmatprep.subr.bf16.mxu0 %v2567_v0 }
 0x1b9   : > { %v697_v57 = vsel %vm695_vm4, %v696_v50, %v694_v52  ;;  %v658_v7 = vmul.f32 %v2253_v44, %v657_v61  ;;  %v638_v61 = vld [vmem:[#allocation7] sm:$0xff] }
 0x1ba   : > { %v711_v2 = vmax.f32 %v697_v57, 1e-08 }
 0x233   : > { %v702_v46 = vpop.xlane.xlu0 %701 }
 0x234   : > { %2256 = vrsqrt.f32 %v702_v46  ;;  %vm705_vm5 = vcmp.eq.f32.partialorder %v702_v46, inf  ;;  %v708_v55 = vand.u32 2147483648, %v702_v46  ;;  %vm707_vm6 = vcmp.eq.f32.partialorder %v702_v46, 0.0 }
 0x235   : > { %2258 = vlog2.f32 %v653_v45  ;;  %v672_v29 = vpop.xlane.xlu1 %671 }
 0x237   : > { %v680_v48 = vpop.xlane.xlu0 %679 }
 0x238   : > { %2260 = vrsqrt.f32 %v680_v48  ;;  %vm686_vm7 = vcmp.eq.f32.partialorder %v680_v48, inf  ;;  %v689_v1 = vand.u32 2147483648, %v680_v48  ;;  %vm688_vm8 = vcmp.eq.f32.partialorder %v680_v48, 0.0 }
 0x23b   : > { %v675_v22 = vpop.xlane.xlu0 %674 }
 0x23e   : > { %v2257_v51 = vpop.eup %2256 }
 0x23f   : > { %v704_v54 = vmul.f32 %v2257_v51, %v702_v46  ;;  %v2259_v56 = vpop.eup %2258 }
 0x240   : > { %v655_v3 = vmul.f32 0.6931472, %v2259_v56 }
 0x241   : > { %v706_v58 = vsel %vm705_vm5, %v702_v46, %v704_v54  ;;  %vm1349_vm5 = vcmask 256002  }
 0x242   : > { %v2261_v59 = vpop.eup %2260  ;;  %v709_v60 = vsel %vm707_vm6, %v708_v55, %v706_v58  ;;  %v661_v11 = vsel %vm660_vm9, %v658_v7, %v655_v3 }
 0x243   : > { %v712_v62 = vmax.f32 %v709_v60, 1e-08  ;;  %v685_v63 = vmul.f32 %v2261_v59, %v680_v48  ;;  %v662_v15 = vadd.f32 %v661_v11, %v648_v14 }
 0x245   : > { %v687_v4 = vsel %vm686_vm7, %v680_v48, %v685_v63  ;;  %v716_v5 = vrot.slane %v712_v62, %v2907_v20  ;;  %v2939_v16 = vadd.f32 1.0, %v662_v15  ;;  %v639_v62 = vld [vmem:[#allocation7 + $0x8] sm:$0xff] }
 0x246   : > { %v690_v6 = vsel %vm688_vm8, %v689_v1, %v687_v4  ;;  %v2951_v63 = vpack.c.bf16 %v639_v62, %v638_v61  ;;  %v640_v1 = vld [vmem:[#allocation7 + $0x10] sm:$0xff]  ;;  %v1025_v4 = vsel %vm1024_vm12, %v2921_v27, 0.0 }
 0x247   : > { %v710_v9 = vmax.f32 %v690_v6, 1e-08  ;;  %v718_v10 = vmul.f32 %v716_v5, %v711_v2  ;;  %v726_v23 = vrot.slane %v2939_v16, %v2907_v20  ;;  %v641_v2 = vld [vmem:[#allocation7 + $0x18] sm:$0xff] }
 0x248   : > { %2082 = vmatpush3.bf16.msra.mxu1 %v2951_v63  ;;  %v2956_v3 = vpack.c.bf16 %v641_v2, %v640_v1 }
 0x249   : > { %v717_v12 = vmul.f32 %v716_v5, %v710_v9  ;;  %2262 = vrcp.f32 %v718_v10  ;;  %2083 = vmatprep.subr.bf16.mxu1 %v2567_v0 }
 0x24b   : > { %2264 = vrcp.f32 %v717_v12 }
 0x24c   : > { %2085 = vmatpush3.bf16.msra.mxu1 %v2956_v3 }
 0x24d   : > { %2092 = vmatprep.subr.bf16.mxu1 %v2567_v0 }
 0x253   : > { %v2263_v21 = vpop.eup %2262 }
 0x254   : > { %v722_v25 = vmul.f32 %v2263_v21, %v675_v22 }
 0x255   : > { %v2265_v28 = vpop.eup %2264 }
 0x256   : > { %v721_v30 = vmul.f32 %v2265_v28, %v672_v29  ;;  %v728_v31 = vmul.f32 %v726_v23, %v722_v25  ;;  %v2986_v28 = vld [vmem:[%s3234_s13] sm:$0x1] }
 0x258   : > { %v727_v32 = vmul.f32 %v726_v23, %v721_v30  ;;  %v731_v34 = vsel %vm729_vm10, %v728_v31, -inf }
 0x25a   : > { %v730_v33 = vsel %vm729_vm10, %v727_v32, -inf }
 0x25b   : > { %v732_v35 = vmax.f32 %v730_v33, %v731_v34 }
 0x25d   : > { %v733_v36 = vrot.slane %v732_v35, 4 }
 0x25f   : > { %v734_v38 = vmax.f32 %v732_v35, %v733_v36 }
 0x261   : > { %v735_v39 = vrot.slane %v734_v38, 2 }
 0x263   : > { %v736_v40 = vmax.f32 %v734_v38, %v735_v39 }
 0x265   : > { %v737_v41 = vrot.slane %v736_v40, 1 }
 0x267   : > { %v738_v42 = vmax.f32 %v736_v40, %v737_v41 }
 0x269   : > { %v739_v43 = vsub.f32 %v727_v32, %v738_v42  ;;  %v740_v44 = vsub.f32 %v728_v31, %v738_v42 }
 0x26b   : > { %v741_v45 = vmul.f32 1.442695, %v739_v43  ;;  %v743_v46 = vmul.f32 1.442695, %v740_v44  ;;  %v643_v44 = vld [vmem:[%s3235_s0] sm:$0xff] }
 0x26d   : > { %2266 = vpow2.f32 %v741_v45  ;;  %v644_v45 = vld [vmem:[%s3235_s0 + $0x8] sm:$0xff] }
 0x26e   : > { %2268 = vpow2.f32 %v743_v46  ;;  %v645_v46 = vld [vmem:[%s3235_s0 + $0x10] sm:$0xff] }
 0x277   : > { %v2267_v47 = vpop.eup %2266 }
 0x278   : > { %v2269_v48 = vpop.eup %2268  ;;  %v745_v49 = vsel %vm729_vm10, %v2267_v47, 0.0 }
 0x279   : > { %v746_v50 = vsel %vm729_vm10, %v2269_v48, 0.0 }
 0x27a   : > { %v747_v51 = vadd.f32 %v746_v50, %v745_v49 }
 0x27c   : > { %v748_v52 = vrot.slane %v747_v51, 4 }
 0x27e   : > { %v749_v53 = vadd.f32 %v748_v52, %v747_v51 }
 0x280   : > { %v750_v54 = vrot.slane %v749_v53, 2 }
 0x282   : > { %v751_v55 = vadd.f32 %v750_v54, %v749_v53 }
 0x284   : > { %v752_v56 = vrot.slane %v751_v55, 1 }
 0x286   : > { %v753_v57 = vadd.f32 %v752_v56, %v751_v55 }
 0x288   : > { %2270 = vrcp.f32 %v753_v57 }
 0x292   : > { %v2271_v58 = vpop.eup %2270 }
 0x293   : > { %v756_v59 = vmul.f32 %v2271_v58, %v2269_v48  ;;  %v755_v60 = vmul.f32 %v2271_v58, %v2267_v47  ;;  %v2087_v47 = vpack.c.bf16 %v644_v45, %v643_v44  ;;  %v646_v48 = vld [vmem:[%s3235_s0 + $0x18] sm:$0xff]  ;;  %v3017_v58 = vld [vmem:[%s3236_s18] sm:$0x1] }
 0x294   : > { %v2090_v49 = vpack.c.bf16 %v646_v48, %v645_v46 }
 0x295   : > { %764 = vperm.xlu0 %2251, %v756_v59   ;;  %759 = vperm.xlu1 %2250, %v755_v60  }
 0x296   : > { %2088 = vmatpush3.bf16.msra.mxu0 %v2087_v47 }
 0x297   : > { %2089 = vmatprep.subr.bf16.mxu0 %v2567_v0 }
 0x299   : > { %852 = vrot.lane.b32.xlu1 %v2913_v24, %s2565_s2 }
 0x29a   : > { %2091 = vmatpush3.bf16.msra.mxu0 %v2090_v49 }
 0x29b   : > { %2098 = vmatprep.subr.bf16.mxu0 %v2567_v0 }
 0x29d   : > { %861 = vrot.lane.b32.xlu1 %v2913_v24, %s2566_s12 }
 0x2b4   : > { %1026 = vadd.xlane.f32.xlu0 %v1025_v4 }
 0x314   : > { %v2966_v5 = vpop.permute.xlu0 %764  ;;  %v2968_v6 = vpop.permute.xlu1 %759 }
 0x315   : > { %v768_v7 = vmul.f32 %v2966_v5, %v2894_v13  ;;  %v767_v9 = vmul.f32 %v2968_v6, %v2917_v26 }
 0x317   : > { %v770_v10 = vsel %vm563_vm1, %v768_v7, 0.0  ;;  %v769_v11 = vsel %vm563_vm1, %v767_v9, 0.0 }
 0x318   : > { %v771_v12 = vadd.f32 %v770_v10, %v769_v11  ;;  %v853_v32 = vpop.permute.xlu1 %852 }
 0x31a   : > { %v772_v14 = vrot.slane %v771_v12, 4 }
 0x31c   : > { %v773_v15 = vadd.f32 %v772_v14, %v771_v12  ;;  %v862_v40 = vpop.permute.xlu1 %861 }
 0x31e   : > { %v774_v21 = vrot.slane %v773_v15, 2 }
 0x320   : > { %v775_v22 = vadd.f32 %v774_v21, %v773_v15 }
 0x322   : > { %v776_v23 = vrot.slane %v775_v22, 1 }
 0x324   : > { %v777_v25 = vadd.f32 %v776_v23, %v775_v22 }
 0x326   : > { %2000 = vmatmul.mubr.msk.f32.vlgmr.msra.gmra.mrb[0].mxu1 %vm563_vm1, %v777_v25 }
 0x327   : > { %2094 = vmatpush3.bf16.msra.mxu1 %v2951_v63  ;;  %2021 = vmatprep.mubr.msk.f32.mxu1 %vm2568_vm11, %v2563_v8 }
 0x328   : > { %2095 = vmatprep.subr.bf16.mxu1 %v2567_v0 }
 0x32b   : > { %2097 = vmatpush3.bf16.msra.mxu1 %v2956_v3 }
 0x32c   : > { %2104 = vmatprep.subr.bf16.mxu1 %v2567_v0 }
 0x3f9   : > { %v847_v29 = vpop.f32.mrb[0].mxu1 }
 0x3fa   : > { %v848_v30 = vadd.f32 %v847_v29, %v2986_v28  ;;  %v2001_v31 = vpop.f32.mrb[1].mxu1 }
 0x3fc   : > { %v855_v33 = vadd.f32 %v853_v32, %v848_v30 }
 0x3fe   : > { %v856_v34 = vsub.f32 0.0, %v855_v33 }
 0x400   : > { %v857_v35 = vmul.f32 1.442695, %v856_v34 }
 0x402   : > { %2272 = vpow2.f32 %v857_v35 }
 0x40c   : > { %v2273_v36 = vpop.eup %2272 }
 0x40d   : > { %v859_v38 = vadd.f32 1.0, %v2273_v36 }
 0x40f   : > { %2274 = vrcp.f32 %v859_v38 }
 0x419   : > { %v2275_v39 = vpop.eup %2274 }
 0x41a   : > { %v864_v41 = vmul.f32 %v2275_v39, %v862_v40  ;;  %v871_v52 = vsub.f32 1.0, %v2275_v39 }
 0x41c   : > { %866 = vrot.lane.b32.xlu1 %v864_v41, %s2569_s14 }
 0x48e   : > { %v867_v42 = vpop.permute.xlu1 %866 }
 0x48f   : > { %v869_v43 = vadd.f32 %v867_v42, %v848_v30 }
 0x491   : > { %2276 = vtanh.f32 %v869_v43 }
 0x49b   : > { %v2277_v50 = vpop.eup %2276 }
 0x49c   : > { %873 = vrot.lane.b32.xlu1 %v2277_v50, %s2565_s2 }
 0x4a0   : > { %877 = vrot.lane.b32.xlu1 %v2899_v17, %s2566_s12 }
 0x50e   : > { %v874_v51 = vpop.permute.xlu1 %873 }
 0x50f   : > { %v876_v54 = vmul.f32 %v874_v51, %v871_v52 }
 0x512   : > { %v878_v53 = vpop.permute.xlu1 %877 }
 0x513   : > { %v880_v55 = vmul.f32 %v2275_v39, %v878_v53  ;;  %v1027_v39 = vpop.xlane.xlu0 %1026 }
 0x514   : > { %vm1030_vm13 = vcmp.eq.f32.partialorder %v1027_v39, inf  ;;  %v1033_v45 = vand.u32 2147483648, %v1027_v39  ;;  %vm1032_vm14 = vcmp.eq.f32.partialorder %v1027_v39, 0.0 }
 0x515   : > { %v881_v56 = vadd.f32 %v880_v55, %v876_v54 }
 0x517   : > { %883 = vrot.lane.b32.xlu1 %v881_v56, %s2565_s2 }
 0x589   : > { %v884_v57 = vpop.permute.xlu1 %883 }
 0x58a   : > { %989 = vst.msk [vmem:[#allocation2] sm:$0x1] %vm699_vm2, %v884_v57  ;;  %2011 = vmatmul.mubr.msk.f32.vlgmr.msra.gmra.mrb[2].mxu0 %vm563_vm1, %v884_v57 }
 0x58b   : > { %2100 = vmatpush3.bf16.msra.mxu0 %v2087_v47  ;;  %2032 = vmatprep.mubr.msk.f32.mxu0 %vm2568_vm11, %v2563_v8 }
 0x58c   : > { %2101 = vmatprep.subr.bf16.mxu0 %v2567_v0 }
 0x58f   : > { %2103 = vmatpush3.bf16.msra.mxu0 %v2090_v49 }
 0x590   : > { %2110 = vmatprep.subr.bf16.mxu0 %v2567_v0 }
 0x65d   : > { %v953_v59 = vpop.f32.mrb[2].mxu0 }
 0x65e   : > { %v954_v60 = vadd.f32 %v953_v59, %v3017_v58  ;;  %v2012_v61 = vpop.f32.mrb[3].mxu0 }
 0x660   : > { %v975_v62 = vrot.slane %v954_v60, %v2907_v20  ;;  %v957_v4 = vsub.f32 0.0, %v954_v60 }
 0x662   : > { %v976_v1 = vmul.f32 %v975_v62, %v2968_v6  ;;  %v977_v2 = vmul.f32 %v975_v62, %v2966_v5  ;;  %v958_v7 = vmul.f32 1.442695, %v957_v4 }
 0x664   : > { %980 = vrot.lane.b32.xlu1 %v976_v1, %s2565_s2  ;;  %2278 = vpow2.f32 %v958_v7 }
 0x668   : > { %982 = vrot.lane.b32.xlu1 %v977_v2, %s2565_s2 }
 0x66e   : > { %v2279_v9 = vpop.eup %2278 }
 0x66f   : > { %v960_v10 = vadd.f32 1.0, %v2279_v9  ;;  %v1051_v9 = vrot.slane %v2939_v16, %v2935_v37 }
 0x671   : > { %2280 = vrcp.f32 %v960_v10 }
 0x672   : > { %2282 = vrsqrt.f32 %v1027_v39 }
 0x67b   : > { %v2281_v11 = vpop.eup %2280 }
 0x67c   : > { %v965_v12 = vrot.slane %v2281_v11, %v2907_v20  ;;  %v2283_v40 = vpop.eup %2282 }
 0x67d   : > { %v1029_v42 = vmul.f32 %v2283_v40, %v1027_v39 }
 0x67e   : > { %v966_v14 = vmul.f32 %v965_v12, %v2968_v6  ;;  %v967_v21 = vmul.f32 %v965_v12, %v2966_v5  ;;  %v993_v6 = vrot.slane %v2913_v24, %v2935_v37 }
 0x67f   : > { %v1031_v44 = vsel %vm1030_vm13, %v1027_v39, %v1029_v42 }
 0x680   : > { %v968_v15 = vsub.f32 1.0, %v966_v14  ;;  %v969_v23 = vsub.f32 1.0, %v967_v21  ;;  %v1034_v46 = vsel %vm1032_vm14, %v1033_v45, %v1031_v44 }
 0x681   : > { %v1037_v48 = vmax.f32 %v1034_v46, 1e-08 }
 0x682   : > { %v970_v22 = vmul.f32 %v968_v15, %v2917_v26  ;;  %v971_v30 = vmul.f32 %v969_v23, %v2894_v13 }
 0x683   : > { %v1041_v55 = vrot.slane %v1037_v48, %v2935_v37 }
 0x6d6   : > { %v981_v25 = vpop.permute.xlu1 %980 }
 0x6d7   : > { %v3029_v29 = vadd.f32 %v981_v25, %v970_v22 }
 0x6d9   : > { %v1002_v31 = vmul.f32 %v3029_v29, %v3029_v29  ;;  %v994_v36 = vmul.f32 %v993_v6, %v3029_v29 }
 0x6da   : > { %v983_v32 = vpop.permute.xlu1 %982 }
 0x6db   : > { %v3034_v33 = vadd.f32 %v983_v32, %v971_v30  ;;  %v1004_v34 = vsel %vm563_vm1, %v1002_v31, 0.0  ;;  %v996_v38 = vsel %vm563_vm1, %v994_v36, 0.0 }
 0x6dc   : > { %1005 = vadd.xlane.f32.xlu1 %v1004_v34 }
 0x6dd   : > { %v1003_v26 = vmul.f32 %v3034_v33, %v3034_v33  ;;  %v995_v5 = vmul.f32 %v993_v6, %v3034_v33 }
 0x6df   : > { %v1007_v35 = vsel %vm563_vm1, %v1003_v26, 0.0  ;;  %v999_v13 = vsel %vm563_vm1, %v995_v5, 0.0 }
 0x6e0   : > { %1008 = vadd.xlane.f32.xlu0 %v1007_v35  ;;  %1000 = vadd.xlane.f32.xlu1 %v999_v13 }
 0x6e4   : > { %997 = vadd.xlane.f32.xlu0 %v996_v38 }
 0x769   : > { %v1006_v41 = vpop.xlane.xlu1 %1005 }
 0x76a   : > { %2284 = vrsqrt.f32 %v1006_v41  ;;  %vm1012_vm15 = vcmp.eq.f32.partialorder %v1006_v41, inf  ;;  %v1015_v50 = vand.u32 2147483648, %v1006_v41  ;;  %vm1014_vm0 = vcmp.eq.f32.partialorder %v1006_v41, 0.0 }
 0x76d   : > { %v1009_v43 = vpop.xlane.xlu0 %1008  ;;  %v1001_v11 = vpop.xlane.xlu1 %1000 }
 0x76e   : > { %2286 = vrsqrt.f32 %v1009_v43  ;;  %vm1019_vm3 = vcmp.eq.f32.partialorder %v1009_v43, inf  ;;  %v1022_v57 = vand.u32 2147483648, %v1009_v43  ;;  %vm1021_vm4 = vcmp.eq.f32.partialorder %v1009_v43, 0.0 }
 0x771   : > { %v998_v4 = vpop.xlane.xlu0 %997 }
 0x774   : > { %v2285_v47 = vpop.eup %2284 }
 0x775   : > { %v1011_v49 = vmul.f32 %v2285_v47, %v1006_v41 }
 0x777   : > { %v1013_v51 = vsel %vm1012_vm15, %v1006_v41, %v1011_v49  ;;  %vm1745_vm15 = vcmask 264448  }
 0x778   : > { %v2287_v52 = vpop.eup %2286  ;;  %v1016_v53 = vsel %vm1014_vm0, %v1015_v50, %v1013_v51  ;;  %v1175_v50 = vrot.slane %v2913_v24, 1 }
 0x779   : > { %v1018_v54 = vmul.f32 %v2287_v52, %v1009_v43  ;;  %v1035_v56 = vmax.f32 %v1016_v53, 1e-08 }
 0x77b   : > { %v1020_v59 = vsel %vm1019_vm3, %v1009_v43, %v1018_v54  ;;  %v1042_v60 = vmul.f32 %v1041_v55, %v1035_v56  ;;  %vm1751_vm3 = vcmask 289032  }
 0x77c   : > { %v1023_v61 = vsel %vm1021_vm4, %v1022_v57, %v1020_v59  ;;  %vm1757_vm4 = vcmask 321824  }
 0x77d   : > { %v1036_v62 = vmax.f32 %v1023_v61, 1e-08  ;;  %2288 = vrcp.f32 %v1042_v60 }
 0x77f   : > { %v1043_v1 = vmul.f32 %v1041_v55, %v1036_v62 }
 0x781   : > { %2290 = vrcp.f32 %v1043_v1 }
 0x787   : > { %v2289_v2 = vpop.eup %2288 }
 0x788   : > { %v1046_v7 = vmul.f32 %v2289_v2, %v998_v4 }
 0x78a   : > { %v1052_v14 = vmul.f32 %v1051_v9, %v1046_v7 }
 0x78b   : > { %v2291_v10 = vpop.eup %2290 }
 0x78c   : > { %v1047_v12 = vmul.f32 %v2291_v10, %v1001_v11  ;;  %v1054_v22 = vsel %vm729_vm10, %v1052_v14, -inf }
 0x78e   : > { %v1053_v15 = vmul.f32 %v1051_v9, %v1047_v12 }
 0x790   : > { %v1055_v21 = vsel %vm729_vm10, %v1053_v15, -inf }
 0x791   : > { %v1056_v23 = vmax.f32 %v1054_v22, %v1055_v21 }
 0x793   : > { %v1057_v25 = vrot.slane %v1056_v23, 4 }
 0x795   : > { %v1058_v30 = vmax.f32 %v1056_v23, %v1057_v25 }
 0x797   : > { %v1059_v31 = vrot.slane %v1058_v30, 2 }
 0x799   : > { %v1060_v32 = vmax.f32 %v1058_v30, %v1059_v31 }
 0x79b   : > { %v1061_v34 = vrot.slane %v1060_v32, 1 }
 0x79d   : > { %v1062_v6 = vmax.f32 %v1060_v32, %v1061_v34 }
 0x79f   : > { %v1063_v26 = vsub.f32 %v1052_v14, %v1062_v6  ;;  %v1064_v5 = vsub.f32 %v1053_v15, %v1062_v6 }
 0x7a1   : > { %v1065_v35 = vmul.f32 1.442695, %v1063_v26  ;;  %v1067_v37 = vmul.f32 1.442695, %v1064_v5 }
 0x7a3   : > { %2292 = vpow2.f32 %v1065_v35 }
 0x7a4   : > { %2294 = vpow2.f32 %v1067_v37 }
 0x7ad   : > { %v2293_v13 = vpop.eup %2292 }
 0x7ae   : > { %v2295_v36 = vpop.eup %2294  ;;  %v1069_v38 = vsel %vm729_vm10, %v2293_v13, 0.0 }
 0x7af   : > { %v1070_v39 = vsel %vm729_vm10, %v2295_v36, 0.0 }
 0x7b0   : > { %v1071_v40 = vadd.f32 %v1070_v39, %v1069_v38 }
 0x7b2   : > { %v1072_v41 = vrot.slane %v1071_v40, 4 }
 0x7b4   : > { %v1073_v42 = vadd.f32 %v1072_v41, %v1071_v40 }
 0x7b6   : > { %v1074_v43 = vrot.slane %v1073_v42, 2 }
 0x7b8   : > { %v1075_v44 = vadd.f32 %v1074_v43, %v1073_v42  ;;  %v1350_v42 = vsel %vm1349_vm5, %v2921_v27, 0.0  ;;  %vm1763_vm5 = vcmask 452928  }
 0x7ba   : > { %v1076_v45 = vrot.slane %v1075_v44, 1 }
 0x7bc   : > { %v1077_v46 = vadd.f32 %v1076_v45, %v1075_v44 }
 0x7be   : > { %2296 = vrcp.f32 %v1077_v46 }
 0x7c8   : > { %v2297_v47 = vpop.eup %2296 }
 0x7c9   : > { %v1080_v48 = vmul.f32 %v2297_v47, %v2295_v36  ;;  %v1079_v49 = vmul.f32 %v2297_v47, %v2293_v13 }
 0x7cb   : > { %1088 = vperm.xlu1 %2250, %v1080_v48   ;;  %1083 = vperm.xlu0 %2251, %v1079_v49  }
 0x7cf   : > { %1176 = vrot.lane.b32.xlu1 %v1175_v50, %s2565_s2  ;;  %1185 = vrot.lane.b32.xlu0 %v1175_v50, %s2566_s12 }
 0x84a   : > { %v3056_v51 = vpop.permute.xlu1 %1088  ;;  %v3058_v52 = vpop.permute.xlu0 %1083 }
 0x84b   : > { %v1092_v53 = vmul.f32 %v3056_v51, %v3034_v33  ;;  %v1091_v54 = vmul.f32 %v3058_v52, %v3029_v29 }
 0x84d   : > { %v1094_v55 = vsel %vm563_vm1, %v1092_v53, 0.0  ;;  %v1093_v56 = vsel %vm563_vm1, %v1091_v54, 0.0  ;;  %v1317_v54 = vsub.s32 2, %v2904_v19 }
 0x84e   : > { %v1095_v57 = vadd.f32 %v1094_v55, %v1093_v56  ;;  %v1177_v10 = vpop.permute.xlu1 %1176  ;;  %v1186_v22 = vpop.permute.xlu0 %1185 }
 0x850   : > { %v1096_v59 = vrot.slane %v1095_v57, 4 }
 0x852   : > { %v1097_v60 = vadd.f32 %v1096_v59, %v1095_v57 }
 0x854   : > { %v1098_v61 = vrot.slane %v1097_v60, 2 }
 0x856   : > { %v1099_v62 = vadd.f32 %v1098_v61, %v1097_v60 }
 0x858   : > { %v1100_v1 = vrot.slane %v1099_v62, 1 }
 0x85a   : > { %v1101_v2 = vadd.f32 %v1100_v1, %v1099_v62 }
 0x85c   : > { %2022 = vmatmul.mubr.msk.f32.vlgmr.msra.gmra.mrb[2].mxu1 %vm563_vm1, %v1101_v2 }
 0x85d   : > { %2106 = vmatpush3.bf16.msra.mxu1 %v2951_v63  ;;  %2043 = vmatprep.mubr.msk.f32.mxu1 %vm2568_vm11, %v2563_v8 }
 0x85e   : > { %2107 = vmatprep.subr.bf16.mxu1 %v2567_v0 }
 0x861   : > { %2109 = vmatpush3.bf16.msra.mxu1 %v2956_v3  ;;  %v1201_v3 = vrot.slane %v2899_v17, 1 }
 0x862   : > { %2116 = vmatprep.subr.bf16.mxu1 %v2567_v0 }
 0x92f   : > { %v1171_v4 = vpop.f32.mrb[2].mxu1 }
 0x930   : > { %v1172_v7 = vadd.f32 %v1171_v4, %v2986_v28  ;;  %v2023_v9 = vpop.f32.mrb[3].mxu1 }
 0x932   : > { %v1179_v11 = vadd.f32 %v1177_v10, %v1172_v7 }
 0x934   : > { %v1180_v12 = vsub.f32 0.0, %v1179_v11 }
 0x936   : > { %v1181_v14 = vmul.f32 1.442695, %v1180_v12 }
 0x938   : > { %2298 = vpow2.f32 %v1181_v14 }
 0x942   : > { %v2299_v15 = vpop.eup %2298 }
 0x943   : > { %v1183_v63 = vadd.f32 1.0, %v2299_v15 }
 0x945   : > { %2300 = vrcp.f32 %v1183_v63 }
 0x94f   : > { %v2301_v21 = vpop.eup %2300 }
 0x950   : > { %v1188_v23 = vmul.f32 %v2301_v21, %v1186_v22  ;;  %v1195_v34 = vsub.f32 1.0, %v2301_v21 }
 0x952   : > { %1190 = vrot.lane.b32.xlu1 %v1188_v23, %s2569_s14 }
 0x956   : > { %1202 = vrot.lane.b32.xlu1 %v1201_v3, %s2566_s12 }
 0x9c4   : > { %v1191_v25 = vpop.permute.xlu1 %1190 }
 0x9c5   : > { %v1193_v30 = vadd.f32 %v1191_v25, %v1172_v7 }
 0x9c7   : > { %2302 = vtanh.f32 %v1193_v30 }
 0x9c8   : > { %v1203_v32 = vpop.permute.xlu1 %1202 }
 0x9c9   : > { %v1205_v26 = vmul.f32 %v2301_v21, %v1203_v32 }
 0x9d1   : > { %v2303_v31 = vpop.eup %2302 }
 0x9d2   : > { %1197 = vrot.lane.b32.xlu0 %v2303_v31, %s2565_s2 }
 0xa44   : > { %v1198_v6 = vpop.permute.xlu0 %1197 }
 0xa45   : > { %v1200_v5 = vmul.f32 %v1198_v6, %v1195_v34 }
 0xa47   : > { %v1206_v35 = vadd.f32 %v1205_v26, %v1200_v5 }
 0xa49   : > { %1208 = vrot.lane.b32.xlu0 %v1206_v35, %s2565_s2 }
 0xabb   : > { %v1209_v37 = vpop.permute.xlu0 %1208 }
 0xabc   : > { %1314 = vst.msk [vmem:[#allocation2 + $0x1] sm:$0x1] %vm699_vm2, %v1209_v37  ;;  %2033 = vmatmul.mubr.msk.f32.vlgmr.msra.gmra.mrb[4].mxu0 %vm563_vm1, %v1209_v37 }
 0xabd   : > { %2054 = vmatprep.mubr.msk.f32.mxu0 %vm2568_vm11, %v2563_v8 }
 0xb8f   : > { %v1278_v13 = vpop.f32.mrb[4].mxu0 }
 0xb90   : > { %v1279_v36 = vadd.f32 %v1278_v13, %v3017_v58  ;;  %v2034_v38 = vpop.f32.mrb[5].mxu0 }
 0xb92   : > { %v1300_v39 = vrot.slane %v1279_v36, %v2907_v20  ;;  %v1282_v43 = vsub.f32 0.0, %v1279_v36 }
 0xb94   : > { %v1302_v40 = vmul.f32 %v1300_v39, %v3056_v51  ;;  %v1301_v41 = vmul.f32 %v1300_v39, %v3058_v52  ;;  %v1283_v44 = vmul.f32 1.442695, %v1282_v43  ;;  %v1376_v39 = vrot.slane %v2939_v16, %v1317_v54 }
 0xb96   : > { %1307 = vrot.lane.b32.xlu0 %v1302_v40, %s2565_s2  ;;  %1305 = vrot.lane.b32.xlu1 %v1301_v41, %s2565_s2  ;;  %2304 = vpow2.f32 %v1283_v44 }
 0xba0   : > { %v2305_v45 = vpop.eup %2304 }
 0xba1   : > { %v1285_v58 = vadd.f32 1.0, %v2305_v45 }
 0xba3   : > { %2306 = vrcp.f32 %v1285_v58 }
 0xbad   : > { %v2307_v46 = vpop.eup %2306 }
 0xbae   : > { %v1290_v47 = vrot.slane %v2307_v46, %v2907_v20  ;;  %v1318_v20 = vrot.slane %v2913_v24, %v1317_v54 }
 0xbb0   : > { %v1292_v48 = vmul.f32 %v1290_v47, %v3056_v51  ;;  %v1291_v49 = vmul.f32 %v1290_v47, %v3058_v52 }
 0xbb2   : > { %v1294_v50 = vsub.f32 1.0, %v1292_v48  ;;  %v1293_v53 = vsub.f32 1.0, %v1291_v49 }
 0xbb4   : > { %v1296_v27 = vmul.f32 %v1294_v50, %v3034_v33  ;;  %v1295_v55 = vmul.f32 %v1293_v53, %v3029_v29 }
 0xbba   : > { %1351 = vadd.xlane.f32.xlu1 %v1350_v42 }
 0xc08   : > { %v1308_v56 = vpop.permute.xlu0 %1307  ;;  %v1306_v57 = vpop.permute.xlu1 %1305 }
 0xc09   : > { %v3096_v59 = vadd.f32 %v1308_v56, %v1296_v27  ;;  %v3098_v60 = vadd.f32 %v1306_v57, %v1295_v55 }
 0xc0b   : > { %v1327_v51 = vmul.f32 %v3098_v60, %v3098_v60  ;;  %v1319_v52 = vmul.f32 %v1318_v20, %v3098_v60  ;;  %v1328_v29 = vmul.f32 %v3096_v59, %v3096_v59  ;;  %v1320_v62 = vmul.f32 %v1318_v20, %v3096_v59 }
 0xc0d   : > { %v1329_v61 = vsel %vm563_vm1, %v1327_v51, 0.0  ;;  %v1321_v19 = vsel %vm563_vm1, %v1319_v52, 0.0  ;;  %v1332_v33 = vsel %vm563_vm1, %v1328_v29, 0.0  ;;  %v1324_v1 = vsel %vm563_vm1, %v1320_v62, 0.0 }
 0xc0e   : > { %1330 = vadd.xlane.f32.xlu0 %v1329_v61  ;;  %1322 = vadd.xlane.f32.xlu1 %v1321_v19 }
 0xc12   : > { %1333 = vadd.xlane.f32.xlu0 %v1332_v33 }
 0xc16   : > { %1325 = vadd.xlane.f32.xlu0 %v1324_v1 }
 0xc47   : > { %v1352_v2 = vpop.xlane.xlu1 %1351 }
 0xc48   : > { %2308 = vrsqrt.f32 %v1352_v2  ;;  %vm1355_vm6 = vcmp.eq.f32.partialorder %v1352_v2, inf  ;;  %v1358_v12 = vand.u32 2147483648, %v1352_v2  ;;  %vm1357_vm7 = vcmp.eq.f32.partialorder %v1352_v2, 0.0 }
 0xc52   : > { %v2309_v4 = vpop.eup %2308 }
 0xc53   : > { %v1354_v9 = vmul.f32 %v2309_v4, %v1352_v2 }
 0xc55   : > { %v1356_v11 = vsel %vm1355_vm6, %v1352_v2, %v1354_v9  ;;  %vm1769_vm6 = vcmask 846272  }
 0xc56   : > { %v1359_v14 = vsel %vm1357_vm7, %v1358_v12, %v1356_v11  ;;  %vm1771_vm7 = vcmask 1043264  }
 0xc57   : > { %v1362_v63 = vmax.f32 %v1359_v14, 1e-08 }
 0xc59   : > { %v1366_v31 = vrot.slane %v1362_v63, %v1317_v54 }
 0xc9b   : > { %v1331_v7 = vpop.xlane.xlu0 %1330  ;;  %v1323_v36 = vpop.xlane.xlu1 %1322 }
 0xc9c   : > { %2310 = vrsqrt.f32 %v1331_v7  ;;  %vm1337_vm8 = vcmp.eq.f32.partialorder %v1331_v7, inf  ;;  %v1340_v22 = vand.u32 2147483648, %v1331_v7  ;;  %vm1339_vm9 = vcmp.eq.f32.partialorder %v1331_v7, 0.0 }
 0xc9f   : > { %v1334_v10 = vpop.xlane.xlu0 %1333 }
 0xca0   : > { %2312 = vrsqrt.f32 %v1334_v10  ;;  %vm1344_vm12 = vcmp.eq.f32.partialorder %v1334_v10, inf  ;;  %v1347_v34 = vand.u32 2147483648, %v1334_v10  ;;  %vm1346_vm13 = vcmp.eq.f32.partialorder %v1334_v10, 0.0 }
 0xca3   : > { %v1326_v41 = vpop.xlane.xlu0 %1325 }
 0xca6   : > { %v2311_v15 = vpop.eup %2310 }
 0xca7   : > { %v1336_v21 = vmul.f32 %v2311_v15, %v1331_v7 }
 0xca9   : > { %v1338_v23 = vsel %vm1337_vm8, %v1331_v7, %v1336_v21 }
 0xcaa   : > { %v2313_v3 = vpop.eup %2312  ;;  %v1341_v25 = vsel %vm1339_vm9, %v1340_v22, %v1338_v23 }
 0xcab   : > { %v1360_v30 = vmax.f32 %v1341_v25, 1e-08  ;;  %v1343_v32 = vmul.f32 %v2313_v3, %v1334_v10 }
 0xcad   : > { %v1367_v6 = vmul.f32 %v1366_v31, %v1360_v30  ;;  %v1345_v26 = vsel %vm1344_vm12, %v1334_v10, %v1343_v32  ;;  %v1500_v10 = vrot.slane %v2913_v24, 2 }
 0xcae   : > { %v1348_v5 = vsel %vm1346_vm13, %v1347_v34, %v1345_v26 }
 0xcaf   : > { %2314 = vrcp.f32 %v1367_v6  ;;  %v1361_v35 = vmax.f32 %v1348_v5, 1e-08 }
 0xcb1   : > { %v1368_v37 = vmul.f32 %v1366_v31, %v1361_v35 }
 0xcb3   : > { %2316 = vrcp.f32 %v1368_v37 }
 0xcb9   : > { %v2315_v13 = vpop.eup %2314 }
 0xcba   : > { %v1371_v38 = vmul.f32 %v2315_v13, %v1323_v36 }
 0xcbc   : > { %v1377_v42 = vmul.f32 %v1376_v39, %v1371_v38 }
 0xcbd   : > { %v2317_v40 = vpop.eup %2316 }
 0xcbe   : > { %v1372_v43 = vmul.f32 %v2317_v40, %v1326_v41  ;;  %v1379_v45 = vsel %vm729_vm10, %v1377_v42, -inf }
 0xcc0   : > { %v1378_v44 = vmul.f32 %v1376_v39, %v1372_v43  ;;  %v1526_v39 = vrot.slane %v2899_v17, 2  ;;  %v1539_v43 = vld [vmem:[#allocation8 + $0x8] sm:$0xff] }
 0xcc2   : > { %v1380_v58 = vsel %vm729_vm10, %v1378_v44, -inf }
 0xcc3   : > { %v1381_v46 = vmax.f32 %v1379_v45, %v1380_v58  ;;  %v1540_v45 = vld [vmem:[#allocation8 + $0x10] sm:$0xff]  ;;  %v1541_v58 = vld [vmem:[#allocation8 + $0x18] sm:$0xff] }
 0xcc5   : > { %v1382_v47 = vrot.slane %v1381_v46, 4 }
 0xcc7   : > { %v1383_v48 = vmax.f32 %v1381_v46, %v1382_v47  ;;  %v2114_v46 = vpack.c.bf16 %v1541_v58, %v1540_v45 }
 0xcc9   : > { %v1384_v49 = vrot.slane %v1383_v48, 2 }
 0xccb   : > { %v1385_v50 = vmax.f32 %v1383_v48, %v1384_v49  ;;  %v1623_v49 = vld [vmem:[#allocation10] sm:$0xff] }
 0xccd   : > { %v1386_v53 = vrot.slane %v1385_v50, 1 }
 0xccf   : > { %v1387_v27 = vmax.f32 %v1385_v50, %v1386_v53  ;;  %v1624_v50 = vld [vmem:[#allocation10 + $0x8] sm:$0xff]  ;;  %v1625_v53 = vld [vmem:[#allocation10 + $0x10] sm:$0xff] }
 0xcd1   : > { %v1388_v55 = vsub.f32 %v1377_v42, %v1387_v27  ;;  %v1389_v56 = vsub.f32 %v1378_v44, %v1387_v27  ;;  %v1538_v42 = vld [vmem:[#allocation8] sm:$0xff] }
 0xcd2   : > { %v2111_v44 = vpack.c.bf16 %v1539_v43, %v1538_v42 }
 0xcd3   : > { %v1390_v57 = vmul.f32 1.442695, %v1388_v55  ;;  %v1392_v16 = vmul.f32 1.442695, %v1389_v56  ;;  %v2117_v56 = vpack.c.bf16 %v1624_v50, %v1623_v49 }
 0xcd4   : > { %2112 = vmatpush3.bf16.msra.mxu0 %v2111_v44 }
 0xcd5   : > { %2318 = vpow2.f32 %v1390_v57  ;;  %2113 = vmatprep.subr.bf16.mxu0 %v2567_v0  ;;  %v1626_v57 = vld [vmem:[#allocation10 + $0x18] sm:$0xff] }
 0xcd6   : > { %2320 = vpow2.f32 %v1392_v16 }
 0xcd8   : > { %2115 = vmatpush3.bf16.msra.mxu0 %v2114_v46 }
 0xcdf   : > { %v2319_v54 = vpop.eup %2318 }
 0xce0   : > { %v2321_v20 = vpop.eup %2320  ;;  %v1394_v51 = vsel %vm729_vm10, %v2319_v54, 0.0 }
 0xce1   : > { %v1395_v52 = vsel %vm729_vm10, %v2321_v20, 0.0  ;;  %vm1739_vm10 = vcmask 256000  }
 0xce2   : > { %v1396_v61 = vadd.f32 %v1395_v52, %v1394_v51  ;;  %v1627_v52 = vld [vmem:[#allocation10 + $0x20] sm:$0xff] }
 0xce4   : > { %v1397_v19 = vrot.slane %v1396_v61, 4 }
 0xce6   : > { %v1398_v29 = vadd.f32 %v1397_v19, %v1396_v61  ;;  %v1628_v61 = vld [vmem:[#allocation10 + $0x28] sm:$0xff] }
 0xce7   : > { %v2123_v19 = vpack.c.bf16 %v1628_v61, %v1627_v52 }
 0xce8   : > { %v1399_v33 = vrot.slane %v1398_v29, 2 }
 0xcea   : > { %v1400_v62 = vadd.f32 %v1399_v33, %v1398_v29  ;;  %v1946_v29 = vld [vmem:[%s3237_s4] ss:$0 sm:$0xff] }
 0xcec   : > { %v1401_v1 = vrot.slane %v1400_v62, 1 }
 0xcee   : > { %v1402_v2 = vadd.f32 %v1401_v1, %v1400_v62 }
 0xcf0   : > { %2322 = vrcp.f32 %v1402_v2  ;;  %v1717_v2 = vand.u32 127, %v553_v18 }
 0xcfa   : > { %v2323_v4 = vpop.eup %2322 }
 0xcfb   : > { %v1405_v7 = vmul.f32 %v2323_v4, %v2321_v20  ;;  %v1404_v9 = vmul.f32 %v2323_v4, %v2319_v54  ;;  %v2120_v54 = vpack.c.bf16 %v1626_v57, %v1625_v53  ;;  %v1718_v4 = vcvt.s32.f32 %v1717_v2 }
 0xcfd   : > { %1413 = vperm.xlu0 %2251, %v1405_v7   ;;  %1408 = vperm.xlu1 %2250, %v1404_v9   ;;  %v1948_v7 = vld [vmem:[%s3238_s19] ss:$0 sm:$0xff] }
 0xd01   : > { %1501 = vrot.lane.b32.xlu1 %v1500_v10, %s2565_s2 }
 0xd05   : > { %1510 = vrot.lane.b32.xlu1 %v1500_v10, %s2566_s12 }
 0xd7c   : > { %v1414_v11 = vpop.permute.xlu0 %1413  ;;  %v1409_v12 = vpop.permute.xlu1 %1408 }
 0xd7d   : > { %v1417_v14 = vmul.f32 %v1414_v11, %v3096_v59  ;;  %v1416_v15 = vmul.f32 %v1409_v12, %v3098_v60 }
 0xd7f   : > { %v1419_v63 = vsel %vm563_vm1, %v1417_v14, 0.0  ;;  %v1418_v21 = vsel %vm563_vm1, %v1416_v15, 0.0 }
 0xd80   : > { %v1420_v22 = vadd.f32 %v1419_v63, %v1418_v21  ;;  %v1502_v34 = vpop.permute.xlu1 %1501 }
 0xd82   : > { %v1421_v23 = vrot.slane %v1420_v22, 4 }
 0xd84   : > { %v1422_v3 = vadd.f32 %v1421_v23, %v1420_v22  ;;  %v1511_v36 = vpop.permute.xlu1 %1510 }
 0xd86   : > { %v1423_v25 = vrot.slane %v1422_v3, 2 }
 0xd88   : > { %v1424_v30 = vadd.f32 %v1423_v25, %v1422_v3 }
 0xd8a   : > { %v1425_v24 = vrot.slane %v1424_v30, 1 }
 0xd8c   : > { %v1426_v31 = vadd.f32 %v1425_v24, %v1424_v30 }
 0xd8e   : > { %2044 = vmatmul.mubr.msk.f32.vlgmr.msra.gmra.mrb[4].mxu1 %vm563_vm1, %v1426_v31 }
 0xd8f   : > { %2069 = vmatprep.mubr.msk.f32.mxu1 %vm2568_vm11, %v2563_v8  ;;  %2118 = vmatpush3.bf16.msra.mxu1 %v2117_v56  ;;  %vm1636_vm11 = vcmask 392192  }
 0xd90   : > { %2119 = vmatprep.subr.bf16.mxu1 %v2567_v0 }
 0xd93   : > { %2121 = vmatpush3.bf16.msra.mxu1 %v2120_v54 }
 0xd94   : > { %2122 = vmatprep.subr.bf16.mxu1 %v2567_v0 }
 0xd97   : > { %2124 = vmatpush3.bf16.msra.mxu1 %v2123_v19 }
 0xe61   : > { %v1496_v32 = vpop.f32.mrb[4].mxu1 }
 0xe62   : > { %v1497_v59 = vadd.f32 %v1496_v32, %v2986_v28  ;;  %v2045_v60 = vpop.f32.mrb[5].mxu1 }
 0xe64   : > { %v1504_v6 = vadd.f32 %v1502_v34, %v1497_v59 }
 0xe66   : > { %v1505_v26 = vsub.f32 0.0, %v1504_v6 }
 0xe68   : > { %v1506_v5 = vmul.f32 1.442695, %v1505_v26 }
 0xe6a   : > { %2324 = vpow2.f32 %v1506_v5 }
 0xe74   : > { %v2325_v35 = vpop.eup %2324 }
 0xe75   : > { %v1508_v37 = vadd.f32 1.0, %v2325_v35 }
 0xe77   : > { %2326 = vrcp.f32 %v1508_v37 }
 0xe81   : > { %v2327_v13 = vpop.eup %2326 }
 0xe82   : > { %v1513_v38 = vmul.f32 %v2327_v13, %v1511_v36  ;;  %v1520_v17 = vsub.f32 1.0, %v2327_v13 }
 0xe84   : > { %1515 = vrot.lane.b32.xlu0 %v1513_v38, %s2569_s14 }
 0xe88   : > { %1527 = vrot.lane.b32.xlu0 %v1526_v39, %s2566_s12 }
 0xef6   : > { %v1516_v40 = vpop.permute.xlu0 %1515 }
 0xef7   : > { %v1518_v28 = vadd.f32 %v1516_v40, %v1497_v59 }
 0xef9   : > { %2328 = vtanh.f32 %v1518_v28 }
 0xefa   : > { %v1528_v47 = vpop.permute.xlu0 %1527 }
 0xefb   : > { %v1530_v27 = vmul.f32 %v2327_v13, %v1528_v47 }
 0xf03   : > { %v2329_v41 = vpop.eup %2328 }
 0xf04   : > { %1522 = vrot.lane.b32.xlu1 %v2329_v41, %s2565_s2 }
 0xf76   : > { %v1523_v48 = vpop.permute.xlu1 %1522 }
 0xf77   : > { %v1525_v55 = vmul.f32 %v1523_v48, %v1520_v17 }
 0xf79   : > { %v1531_v16 = vadd.f32 %v1530_v27, %v1525_v55 }
 0xf7b   : > { %1533 = vrot.lane.b32.xlu1 %v1531_v16, %s2565_s2  ;;  %s2570_s2 = smov 1  }
 0xf7f   : > { %1721 = vrot.lane.b32.xlu1 %v1718_v4, %s2570_s2 }
 0xfed   : > { %v1534_v20 = vpop.permute.xlu1 %1533 }
 0xfee   : > { %1536 = vst.msk [vmem:[#allocation2 + $0x2] sm:$0x1] %vm699_vm2, %v1534_v20 }
 0xff1   : > { %v1722_v63 = vpop.permute.xlu1 %1721 }
 0xff5   : > { %v1537_v51 = vld [vmem:[#allocation2] sm:$0x7] }
 0xff6   : > { %2055 = vmatmul.mubr.msk.f32.vlgmr.msra.gmra.mrb[6].mxu0 %vm563_vm1, %v1537_v51  ;;  %1740 = vst.msk [vmem:[%s2888_s21] sm:$0x7] %vm1739_vm10, %v1537_v51  ;;  %vm1712_vm1 = vcmask 26632  }
0x10c9   : > { %v1618_v33 = vpop.f32.mrb[6].mxu0 }
0x10ca   : > { %v1619_v62 = vadd.f32 %v1946_v29, %v1618_v33  ;;  %v2056_v1 = vpop.f32.mrb[7].mxu0 }
0x10cc   : > { %v1622_v0 = vmax.f32 %v1619_v62, 0.0 }
0x10ce   : > { %2070 = vmatmul.mubr.msk.f32.vlgmr.msra.gmra.mrb[6].mxu1 %vm1636_vm11, %v1622_v0 }
0x11a1   : > { %v1706_v9 = vpop.f32.mrb[6].mxu1 }
0x11a2   : > { %v1707_v10 = vadd.f32 %v1948_v7, %v1706_v9  ;;  %v2071_v11 = vpop.f32.mrb[7].mxu1 }
0x11a4   : > { %v1713_v12 = vsel %vm1712_vm1, %v1707_v10, -inf  ;;  %2330 = vtanh.f32 %v1707_v10  ;;  %vm1731_vm2 = vcmp.gt.f32.partialorder %v1707_v10, 0.0  ;;  %v1734_v25 = vsub.f32 0.0, %v1707_v10 }
0x11a5   : > { %1714 = vmax.xlane.f32.xlu0 %v1713_v12  ;;  %v1951_v18 = vsel %vm1731_vm2, 1.0, %v2563_v8 }
0x11a6   : > { %v1735_v30 = vmul.f32 1.442695, %v1734_v25 }
0x11a8   : > { %2332 = vpow2.f32 %v1735_v30 }
0x11ae   : > { %v2331_v14 = vpop.eup %2330 }
0x11af   : > { %v1711_v15 = vand.u32 2147483647, %v2331_v14 }
0x11b2   : > { %v2333_v24 = vpop.eup %2332 }
0x11b3   : > { %v1737_v31 = vadd.f32 1.0, %v2333_v24 }
0x11b5   : > { %2334 = vrcp.f32 %v1737_v31 }
0x11bb   : > { %1742 = vrot.lane.b32.xlu0 %v1711_v15, %s2566_s12 }
0x11bf   : > { %1754 = vrot.lane.b32.xlu0 %v2331_v14, %s2566_s12  ;;  %v2335_v60 = vpop.eup %2334 }
0x11c3   : > { %1760 = vrot.lane.b32.xlu0 %v1951_v18, %s2566_s12 }
0x1232   : > { %v1715_v21 = vpop.xlane.xlu0 %1714 }
0x1233   : > { %vm1719_vm14 = vcmp.ge.f32.partialorder %v1707_v10, %v1715_v21 }
0x1234   : > { %v1724_v22 = vsel %vm1719_vm14, %v1722_v63, 3.0 }
0x1235   : > { %v1725_v23 = vsel %vm1712_vm1, %v1724_v22, inf }
0x1236   : > { %1726 = vmin.xlane.f32.xlu1 %v1725_v23  ;;  %v1743_v3 = vpop.permute.xlu0 %1742 }
0x1237   : > { %1746 = vst.msk [vmem:[%s2888_s21] sm:$0x7] %vm1745_vm15, %v1743_v3 }
0x123a   : > { %v1755_v34 = vpop.permute.xlu0 %1754 }
0x123e   : > { %v1761_v26 = vpop.permute.xlu0 %1760 }
0x12c3   : > { %v1727_v32 = vpop.xlane.xlu1 %1726 }
0x12c4   : > { %vm1728_vm0 = vcmp.eq.f32.partialorder %v1718_v4, %v1727_v32 }
0x12c5   : > { %v1950_v59 = vsel %vm1728_vm0, 1.0, %v2563_v8 }
0x12c6   : > { %1748 = vrot.lane.b32.xlu1 %v1950_v59, %s2571_s16 }
0x12ca   : > { %1766 = vrot.lane.b32.xlu1 %v2335_v60, %s2566_s12 }
0x1338   : > { %v1749_v6 = vpop.permute.xlu1 %1748 }
0x1339   : > { %1752 = vst.msk [vmem:[%s2888_s21] sm:$0x7] %vm1751_vm3, %v1749_v6 }
0x133a   : > { %1758 = vst.msk [vmem:[%s2888_s21] sm:$0x7] %vm1757_vm4, %v1755_v34 }
0x133b   : > { %1764 = vst.msk [vmem:[%s2888_s21] sm:$0x7] %vm1763_vm5, %v1761_v26 }
0x133c   : > { %v1767_v5 = vpop.permute.xlu1 %1766 }
0x133d   : > { %1770 = vst.msk [vmem:[%s2888_s21] sm:$0x7] %vm1769_vm6, %v1767_v5 }
0x133e   : > { %1772 = vst.msk [vmem:[%s2888_s21] sm:$0x7] %vm1771_vm7, %v2563_v8 }
0x133f PF: > { %s27_s28 = sadd.s32 1, %s2552_s28   ;;  %s3239_s21 = smov %s2528_s22 }
0x1340   : > { %p24_p5 = scmp.ge.s32.totalorder %s27_s28, 6   ;;  %s3240_s22 = smov %s2532_s23 }
0x1341   : > { %s3241_s23 = smov %s2812_s5  ;;  %s3242_s24 = smov %s2544_s26 }
0x1342   : > { %s3243_s25 = smov %s2548_s27  ;;  %s3244_s26 = smov %s3247_s15 }
0x1343   : > { %s3245_s27 = smov %s3251_s17  ;;  %26 = sbr.rel (!%p24_p5) target bundleno = 18 (0x12), region = 131 }
0x134a   :  { %1800 = vsyncpa [#allocation4], 1 }
0x134b   :  { %1802 = vsyncpa [#allocation4 + $0x1], 1 }
0x134c   :  { %1803 = vsyncpa [#allocation6], 1 }
0x134d   :  { %1804 = vsyncpa [#allocation9], 1 }

</bundles_post_ra>
